<compile_context>
chip_gen: v5e
topology: v5e:2x2
jax: 0.10.0
libtpu: 0.0.40
codegen_flags: <defaults>
</compile_context>

<pallas_src>
import numpy as np

import jax
import jax.numpy as jnp
from jax import lax
from jax.experimental import pallas as pl
from jax.experimental.pallas import tpu as pltpu

# ----------------------------- small synthetic config -----------------------------
VOCAB = 256
HIDDEN = 128
NUM_HEADS = 4
NUM_KV_HEADS = 2
HEAD_DIM = HIDDEN // NUM_HEADS           # 32
Q_SIZE = NUM_HEADS * HEAD_DIM            # 128
KV_SIZE = NUM_KV_HEADS * HEAD_DIM        # 64
QKV_OUT = Q_SIZE + 2 * KV_SIZE           # 256
GROUP = NUM_HEADS // NUM_KV_HEADS        # 2
INTERMEDIATE = 256
NUM_LAYERS = 2
RMS_EPS = 1e-6
ROPE_THETA = 1_000_000.0
SEQ = 16
DTYPE = jnp.float32
MXU_DTYPE = jnp.bfloat16                 # MXU operand dtype; accumulation stays f32


# ------------------------------- in-kernel helpers ---------------------------------
def _rms(x, w):
    var = jnp.mean(x * x, axis=-1, keepdims=True)
    return x * lax.rsqrt(var + RMS_EPS) * w


# --------------------------- fused whole-stack kernel -------------------------------
def _qwen2_stack_kernel(x_ref, cos_ref, sin_ref, rotp_ref,
                        in_ln_ref, qkv_w_ref, qkv_b_ref, o_w_ref,
                        post_ln_ref, gate_up_w_ref, down_w_ref, final_ln_ref,
                        out_ref, h_sc):
    layer = pl.program_id(0)

    # layer 0: reference's `residual is None` branch — seed the resident pre-norm state
    # with the embeddings (no zero-residual DMA / add).
    @pl.when(layer == 0)
    def _():
        h_sc[...] = x_ref[...]

    r1 = h_sc[...]                                    # hidden + residual, f32
    h = _rms(r1, in_ln_ref[0])                        # input_layernorm

    # ---- qkv_proj (bias); attention scale pre-folded into the q columns of w/b ----
    qkv = jnp.dot(h.astype(MXU_DTYPE), qkv_w_ref[0],
                  preferred_element_type=jnp.float32) + qkv_b_ref[0]
    q = qkv[:, :Q_SIZE]
    k = qkv[:, Q_SIZE:Q_SIZE + KV_SIZE]
    v = qkv[:, Q_SIZE + KV_SIZE:]

    # ---- neox RoPE: rotate-half as a block-diagonal permutation matmul on the MXU
    # (sign folded into the sin table); done in f32 so q/k are rounded only once,
    # at the score matmul below.  cos_k/sin_k are the leading KV_SIZE lanes of cos/sin.
    cos_q = cos_ref[...]
    sin_q = sin_ref[...]
    rot_p = rotp_ref[...]
    q = q * cos_q + jnp.dot(q, rot_p, preferred_element_type=jnp.float32) * sin_q
    k = (k * cos_q[:, :KV_SIZE]
         + jnp.dot(k, rot_p[:KV_SIZE, :KV_SIZE],
                   preferred_element_type=jnp.float32) * sin_q[:, :KV_SIZE])

    # ---- causal GQA attention; K/V of each group shared by its q-heads; head merge
    # folded into o_proj as accumulating MXU ops (no concat relayout). ----
    t = q.shape[0]
    row = lax.broadcasted_iota(jnp.int32, (t, t), 0)
    col = lax.broadcasted_iota(jnp.int32, (t, t), 1)
    causal = col <= row
    q16 = q.astype(MXU_DTYPE)
    o_w = o_w_ref[0]                                  # [Q_SIZE, HIDDEN] bf16
    r2 = r1
    # TODO(synk): at real Qwen2 sizes this becomes a flash-attention-style inner loop
    # (heads batched, f32 running max/sum scratch, KV tiles streamed from HBM).
    for g in range(NUM_KV_HEADS):
        k_g = k[:, g * HEAD_DIM:(g + 1) * HEAD_DIM].astype(MXU_DTYPE)
        v_g = v[:, g * HEAD_DIM:(g + 1) * HEAD_DIM].astype(MXU_DTYPE)
        for hq in range(GROUP):
            h_idx = g * GROUP + hq
            q_h = q16[:, h_idx * HEAD_DIM:(h_idx + 1) * HEAD_DIM]
            s = lax.dot_general(q_h, k_g, (((1,), (1,)), ((), ())),
                                preferred_element_type=jnp.float32)
            s = jnp.where(causal, s, -1e30)           # mask / softmax stay f32
            m = jnp.max(s, axis=-1, keepdims=True)
            p = jnp.exp(s - m)
            p = p * pl.reciprocal(jnp.sum(p, axis=-1, keepdims=True), approx=True)
            o_h = jnp.dot(p.astype(MXU_DTYPE), v_g,
                          preferred_element_type=jnp.float32)      # [T, HEAD_DIM]
            # head merge fused into o_proj: accumulate against this head's o_w rows
            r2 = r2 + jnp.dot(o_h.astype(MXU_DTYPE),
                              o_w[h_idx * HEAD_DIM:(h_idx + 1) * HEAD_DIM, :],
                              preferred_element_type=jnp.float32)

    # ---- post_attention_layernorm + MLP: gate_up -> SiLU*mul -> down ----
    h2 = _rms(r2, post_ln_ref[0])
    gu = jnp.dot(h2.astype(MXU_DTYPE), gate_up_w_ref[0],
                 preferred_element_type=jnp.float32)
    g_act = gu[:, :INTERMEDIATE]
    u = gu[:, INTERMEDIATE:]
    act = g_act * jax.nn.sigmoid(g_act) * u           # SiLU*mul in f32
    mlp_out = jnp.dot(act.astype(MXU_DTYPE), down_w_ref[0],
                      preferred_element_type=jnp.float32)

    # carry the next layer's pre-norm state (hidden + residual) in VMEM
    nxt = mlp_out + r2
    h_sc[...] = nxt

    # fused final RMSNorm of the stack
    @pl.when(layer == pl.num_programs(0) - 1)
    def _():
        out_ref[...] = _rms(nxt, final_ln_ref[...])


# ------------------------------- host-side weight prep ------------------------------
def _rotate_half_perm(n_heads):
    """Block-diagonal permutation P so that x @ P swaps the two halves of every
    HEAD_DIM block of a lane-dense [T, n*HEAD_DIM] slab (rotate-half, sign in sin)."""
    d = n_heads * HEAD_DIM
    half = HEAD_DIM // 2
    p = np.zeros((d, d), dtype=np.float32)
    for h in range(n_heads):
        lo = h * HEAD_DIM
        for i in range(half):
            p[lo + half + i, lo + i] = 1.0      # out[:, lo+i]      <- x[:, lo+half+i]
            p[lo + i, lo + half + i] = 1.0      # out[:, lo+half+i] <- x[:, lo+i]
    return jnp.asarray(p)


def _stack_layer_params(params):
    """Stack per-layer weights behind a leading layer dim, fold the attention scale
    into the q columns of qkv, and cast MXU weight operands to bf16."""
    scale = HEAD_DIM ** -0.5
    layers = params["layers"]

    def fold_w(w):
        return jnp.concatenate([w[:, :Q_SIZE] * scale, w[:, Q_SIZE:]], axis=-1)

    def fold_b(b):
        return jnp.concatenate([b[:Q_SIZE] * scale, b[Q_SIZE:]], axis=-1)

    return dict(
        in_ln=jnp.stack([l["input_ln"][None, :] for l in layers]),           # [L,1,H] f32
        post_ln=jnp.stack([l["post_ln"][None, :] for l in layers]),          # [L,1,H] f32
        qkv_w=jnp.stack([fold_w(l["qkv_w"]) for l in layers]).astype(MXU_DTYPE),
        qkv_b=jnp.stack([fold_b(l["qkv_b"])[None, :] for l in layers]),      # [L,1,QKV] f32
        o_w=jnp.stack([l["o_w"] for l in layers]).astype(MXU_DTYPE),
        gate_up_w=jnp.stack([l["gate_up_w"] for l in layers]).astype(MXU_DTYPE),
        down_w=jnp.stack([l["down_w"] for l in layers]).astype(MXU_DTYPE),
    )


# --------------------------------- model assembly ----------------------------------
def cgm_qwen2_forward(params, input_ids, positions):
    # embed_tokens gather (plain JAX glue)
    hidden = params["embed"][input_ids]                                   # [T, H] f32
    t = hidden.shape[0]

    # neox rope tables (glue): full-width, head-tiled, rotate-half sign folded into sin
    inv_freq = 1.0 / (ROPE_THETA ** (
        jnp.arange(0, HEAD_DIM, 2, dtype=jnp.float32) / HEAD_DIM))
    freqs = positions.astype(jnp.float32)[:, None] * inv_freq[None, :]    # [T, D/2]
    cos = jnp.cos(freqs)
    sin = jnp.sin(freqs)
    cos_q = jnp.tile(jnp.concatenate([cos, cos], axis=-1), (1, NUM_HEADS))   # [T, Q_SIZE]
    sin_q = jnp.tile(jnp.concatenate([-sin, sin], axis=-1), (1, NUM_HEADS))  # [T, Q_SIZE]
    rot_p = _rotate_half_perm(NUM_HEADS)                                     # [Q, Q]

    sp = _stack_layer_params(params)
    final_ln = params["final_ln"][None, :]                                   # [1, H]

    def const_spec(a):
        return pl.BlockSpec(a.shape, lambda l: (0, 0))

    def per_layer_spec(a):
        nd = a.ndim
        return pl.BlockSpec((1,) + a.shape[1:], lambda l: (l,) + (0,) * (nd - 1))

    # advisory cost estimate for XLA scheduling around the custom call
    matmul_flops_per_layer = 2 * t * (
        HIDDEN * QKV_OUT                                   # qkv_proj
        + Q_SIZE * Q_SIZE + KV_SIZE * KV_SIZE              # RoPE permutes
        + NUM_HEADS * (2 * t * HEAD_DIM + HEAD_DIM * HIDDEN)  # attn scores/PV + o_proj
        + HIDDEN * 2 * INTERMEDIATE                        # gate_up
        + INTERMEDIATE * HIDDEN)                           # down
    weight_bytes_per_layer = (2 * (HIDDEN * QKV_OUT + Q_SIZE * HIDDEN
                                   + HIDDEN * 2 * INTERMEDIATE + INTERMEDIATE * HIDDEN)
                              + 4 * (QKV_OUT + 2 * HIDDEN))
    const_bytes = 4 * (2 * t * HIDDEN + 2 * t * Q_SIZE + Q_SIZE * Q_SIZE + HIDDEN)
    cost = pl.CostEstimate(
        flops=NUM_LAYERS * matmul_flops_per_layer,
        transcendentals=NUM_LAYERS * (NUM_HEADS * t * t + t * INTERMEDIATE + 4 * t),
        bytes_accessed=NUM_LAYERS * weight_bytes_per_layer + const_bytes,
    )

    out = pl.pallas_call(
        _qwen2_stack_kernel,
        out_shape=jax.ShapeDtypeStruct((t, HIDDEN), DTYPE),
        grid_spec=pltpu.PrefetchScalarGridSpec(
            num_scalar_prefetch=0,
            grid=(NUM_LAYERS,),
            in_specs=[
                const_spec(hidden), const_spec(cos_q), const_spec(sin_q),
                const_spec(rot_p),
                per_layer_spec(sp["in_ln"]), per_layer_spec(sp["qkv_w"]),
                per_layer_spec(sp["qkv_b"]), per_layer_spec(sp["o_w"]),
                per_layer_spec(sp["post_ln"]), per_layer_spec(sp["gate_up_w"]),
                per_layer_spec(sp["down_w"]), const_spec(final_ln),
            ],
            out_specs=pl.BlockSpec((t, HIDDEN), lambda l: (0, 0)),
            scratch_shapes=[pltpu.VMEM((t, HIDDEN), jnp.float32)],
        ),
        compiler_params=pltpu.CompilerParams(
            dimension_semantics=("arbitrary",),   # layers are sequential (state carry)
            vmem_limit_bytes=32 * 1024 * 1024,
        ),
        cost_estimate=cost,
    )(hidden, cos_q, sin_q, rot_p,
      sp["in_ln"], sp["qkv_w"], sp["qkv_b"], sp["o_w"],
      sp["post_ln"], sp["gate_up_w"], sp["down_w"], final_ln)
    return out


# ------------------------------ deterministic params -------------------------------
def init_params(key):
    def dense(k, shape, scale=0.02):
        return scale * jax.random.normal(k, shape, dtype=DTYPE)

    keys = jax.random.split(key, 1 + NUM_LAYERS)
    params = {
        "embed": dense(keys[0], (VOCAB, HIDDEN)),
        "final_ln": jnp.ones((HIDDEN,), DTYPE),
        "layers": [],
    }
    for li in range(NUM_LAYERS):
        lk = jax.random.split(keys[1 + li], 6)
        params["layers"].append({
            "input_ln": jnp.ones((HIDDEN,), DTYPE),
            "post_ln": jnp.ones((HIDDEN,), DTYPE),
            "qkv_w": dense(lk[0], (HIDDEN, QKV_OUT)),        # [in, out]
            "qkv_b": dense(lk[1], (QKV_OUT,)),
            "o_w": dense(lk[2], (Q_SIZE, HIDDEN)),
            "gate_up_w": dense(lk[3], (HIDDEN, 2 * INTERMEDIATE)),
            "down_w": dense(lk[4], (INTERMEDIATE, HIDDEN)),
        })
    return params


# -------------------------------------- main ---------------------------------------
if __name__ == "__main__":
    key = jax.random.PRNGKey(0)
    pkey, ikey = jax.random.split(key)
    params = init_params(pkey)

    input_ids = jax.random.randint(ikey, (SEQ,), 0, VOCAB, dtype=jnp.int32)
    positions = jnp.arange(SEQ, dtype=jnp.int32)

    hidden_states = jax.jit(cgm_qwen2_forward)(params, input_ids, positions)
    hidden_states = jax.block_until_ready(hidden_states)

    assert hidden_states.shape == (SEQ, HIDDEN)
    assert bool(jnp.all(jnp.isfinite(hidden_states)))
    print("KERNEL_OK")
</pallas_src>

<mosaic_0001>
module attributes {stable_mosaic.version = 11 : i64} {
  func.func @_qwen2_stack_kernel(%arg0: i32, %arg1: memref<16x128xf32, #tpu.memory_space<vmem>>, %arg2: memref<16x128xf32, #tpu.memory_space<vmem>>, %arg3: memref<16x128xf32, #tpu.memory_space<vmem>>, %arg4: memref<128x128xf32, #tpu.memory_space<vmem>>, %arg5: memref<1x1x128xf32, #tpu.memory_space<vmem>>, %arg6: memref<1x128x256xbf16, #tpu.memory_space<vmem>>, %arg7: memref<1x1x256xf32, #tpu.memory_space<vmem>>, %arg8: memref<1x128x128xbf16, #tpu.memory_space<vmem>>, %arg9: memref<1x1x128xf32, #tpu.memory_space<vmem>>, %arg10: memref<1x128x512xbf16, #tpu.memory_space<vmem>>, %arg11: memref<1x256x128xbf16, #tpu.memory_space<vmem>>, %arg12: memref<1x128xf32, #tpu.memory_space<vmem>>, %arg13: memref<16x128xf32, #tpu.memory_space<vmem>>, %arg14: memref<16x128xf32, #tpu.memory_space<vmem>>) attributes {dimension_semantics = [#tpu.dimension_semantics<arbitrary>], iteration_bounds = array<i64: 2>, scalar_prefetch = 0 : i64, scratch_operands = 1 : i64, tpu.core_type = #tpu.core_type<tc>, window_params = [{pipeline_mode = #tpu.pipeline_mode<synchronous>, transform_indices = @transform_0, window_bounds = array<i64: 16, 128>}, {pipeline_mode = #tpu.pipeline_mode<synchronous>, transform_indices = @transform_1, window_bounds = array<i64: 16, 128>}, {pipeline_mode = #tpu.pipeline_mode<synchronous>, transform_indices = @transform_2, window_bounds = array<i64: 16, 128>}, {pipeline_mode = #tpu.pipeline_mode<synchronous>, transform_indices = @transform_3, window_bounds = array<i64: 128, 128>}, {transform_indices = @transform_4, window_bounds = array<i64: 1, 1, 128>}, {transform_indices = @transform_5, window_bounds = array<i64: 1, 128, 256>}, {transform_indices = @transform_6, window_bounds = array<i64: 1, 1, 256>}, {transform_indices = @transform_7, window_bounds = array<i64: 1, 128, 128>}, {transform_indices = @transform_8, window_bounds = array<i64: 1, 1, 128>}, {transform_indices = @transform_9, window_bounds = array<i64: 1, 128, 512>}, {transform_indices = @transform_10, window_bounds = array<i64: 1, 256, 128>}, {pipeline_mode = #tpu.pipeline_mode<synchronous>, transform_indices = @transform_11, window_bounds = array<i64: 1, 128>}, {pipeline_mode = #tpu.pipeline_mode<synchronous>, transform_indices = @transform_12, window_bounds = array<i64: 16, 128>}]} {
    %c0_i32 = arith.constant 0 : i32
    %0 = arith.cmpi eq, %arg0, %c0_i32 : i32
    %1 = arith.extui %0 : i1 to i32
    %c0_i32_0 = arith.constant 0 : i32
    %2 = arith.cmpi ne, %1, %c0_i32_0 : i32
    scf.if %2 {
      %c0_67 = arith.constant 0 : index
      %c0_68 = arith.constant 0 : index
      %173 = vector.load %arg1[%c0_67, %c0_68] : memref<16x128xf32, #tpu.memory_space<vmem>>, vector<16x128xf32>
      %c0_69 = arith.constant 0 : index
      %c0_70 = arith.constant 0 : index
      %174 = vector.load %arg14[%c0_69, %c0_70] : memref<16x128xf32, #tpu.memory_space<vmem>>, vector<16x128xf32>
      tpu.vector_store %arg14[%c0_69, %c0_70], %173 {strides = array<i32>} : memref<16x128xf32, #tpu.memory_space<vmem>>, vector<16x128xf32>,
    } else {
    }
    %c0 = arith.constant 0 : index
    %c0_1 = arith.constant 0 : index
    %3 = vector.load %arg14[%c0, %c0_1] : memref<16x128xf32, #tpu.memory_space<vmem>>, vector<16x128xf32>
    %c0_2 = arith.constant 0 : index
    %c0_3 = arith.constant 0 : index
    %c0_4 = arith.constant 0 : index
    %4 = vector.load %arg5[%c0_2, %c0_3, %c0_4] : memref<1x1x128xf32, #tpu.memory_space<vmem>>, vector<1x1x128xf32>
    %5 = vector.shape_cast %4 : vector<1x1x128xf32> to vector<1x128xf32>
    %6 = arith.mulf %3, %3 : vector<16x128xf32>
    %cst = arith.constant dense<0.000000e+00> : vector<16xf32>
    %7 = vector.multi_reduction <add>, %6, %cst [1] : vector<16x128xf32> to vector<16xf32>
    %8 = vector.shape_cast %7 : vector<16xf32> to vector<16x1xf32>
    %cst_5 = arith.constant 1.280000e+02 : f32
    %9 = vector.broadcast %cst_5 : f32 to vector<16x1xf32>
    %10 = arith.divf %8, %9 : vector<16x1xf32>
    %cst_6 = arith.constant 9.99999997E-7 : f32
    %11 = vector.broadcast %cst_6 : f32 to vector<16x1xf32>
    %12 = arith.addf %10, %11 : vector<16x1xf32>
    %13 = math.rsqrt %12 : vector<16x1xf32>
    %14 = vector.broadcast %13 : vector<16x1xf32> to vector<16x128xf32>
    %15 = arith.mulf %3, %14 : vector<16x128xf32>
    %16 = vector.broadcast %5 : vector<1x128xf32> to vector<16x128xf32>
    %17 = arith.mulf %15, %16 : vector<16x128xf32>
    %18 = arith.truncf %17 : vector<16x128xf32> to vector<16x128xbf16>
    %c0_7 = arith.constant 0 : index
    %c0_8 = arith.constant 0 : index
    %c0_9 = arith.constant 0 : index
    %19 = vector.load %arg6[%c0_7, %c0_8, %c0_9] : memref<1x128x256xbf16, #tpu.memory_space<vmem>>, vector<1x128x256xbf16>
    %20 = vector.shape_cast %19 : vector<1x128x256xbf16> to vector<128x256xbf16>
    %cst_10 = arith.constant dense<0.000000e+00> : vector<16x256xf32>
    %21 = tpu.matmul %18, %20, %cst_10 {dimension_numbers = #tpu.dot_dimension_numbers<[1], [0], [0], [1], [0, 0, 1, 1], [], []>} : vector<16x128xbf16>, vector<128x256xbf16>, vector<16x256xf32> -> vector<16x256xf32>
    %c0_11 = arith.constant 0 : index
    %c0_12 = arith.constant 0 : index
    %c0_13 = arith.constant 0 : index
    %22 = vector.load %arg7[%c0_11, %c0_12, %c0_13] : memref<1x1x256xf32, #tpu.memory_space<vmem>>, vector<1x1x256xf32>
    %23 = vector.shape_cast %22 : vector<1x1x256xf32> to vector<1x256xf32>
    %24 = vector.broadcast %23 : vector<1x256xf32> to vector<16x256xf32>
    %25 = arith.addf %21, %24 : vector<16x256xf32>
    %26 = vector.extract_strided_slice %25 {offsets = [0, 0], sizes = [16, 128], strides = [1, 1]} : vector<16x256xf32> to vector<16x128xf32>
    %27 = vector.extract_strided_slice %25 {offsets = [0, 128], sizes = [16, 64], strides = [1, 1]} : vector<16x256xf32> to vector<16x64xf32>
    %28 = vector.extract_strided_slice %25 {offsets = [0, 192], sizes = [16, 64], strides = [1, 1]} : vector<16x256xf32> to vector<16x64xf32>
    %c0_14 = arith.constant 0 : index
    %c0_15 = arith.constant 0 : index
    %29 = vector.load %arg2[%c0_14, %c0_15] : memref<16x128xf32, #tpu.memory_space<vmem>>, vector<16x128xf32>
    %c0_16 = arith.constant 0 : index
    %c0_17 = arith.constant 0 : index
    %30 = vector.load %arg3[%c0_16, %c0_17] : memref<16x128xf32, #tpu.memory_space<vmem>>, vector<16x128xf32>
    %c0_18 = arith.constant 0 : index
    %c0_19 = arith.constant 0 : index
    %31 = vector.load %arg4[%c0_18, %c0_19] : memref<128x128xf32, #tpu.memory_space<vmem>>, vector<128x128xf32>
    %32 = arith.mulf %26, %29 : vector<16x128xf32>
    %cst_20 = arith.constant dense<0.000000e+00> : vector<16x128xf32>
    %33 = tpu.matmul %26, %31, %cst_20 {dimension_numbers = #tpu.dot_dimension_numbers<[1], [0], [0], [1], [0, 0, 1, 1], [], []>} : vector<16x128xf32>, vector<128x128xf32>, vector<16x128xf32> -> vector<16x128xf32>
    %34 = arith.mulf %33, %30 : vector<16x128xf32>
    %35 = arith.addf %32, %34 : vector<16x128xf32>
    %36 = vector.extract_strided_slice %29 {offsets = [0, 0], sizes = [16, 64], strides = [1, 1]} : vector<16x128xf32> to vector<16x64xf32>
    %37 = arith.mulf %27, %36 : vector<16x64xf32>
    %38 = vector.extract_strided_slice %31 {offsets = [0, 0], sizes = [64, 64], strides = [1, 1]} : vector<128x128xf32> to vector<64x64xf32>
    %cst_21 = arith.constant dense<0.000000e+00> : vector<16x64xf32>
    %39 = tpu.matmul %27, %38, %cst_21 {dimension_numbers = #tpu.dot_dimension_numbers<[1], [0], [0], [1], [0, 0, 1, 1], [], []>} : vector<16x64xf32>, vector<64x64xf32>, vector<16x64xf32> -> vector<16x64xf32>
    %40 = vector.extract_strided_slice %30 {offsets = [0, 0], sizes = [16, 64], strides = [1, 1]} : vector<16x128xf32> to vector<16x64xf32>
    %41 = arith.mulf %39, %40 : vector<16x64xf32>
    %42 = arith.addf %37, %41 : vector<16x64xf32>
    %43 = tpu.iota {dimensions = array<i32: 0>} : vector<16x16xi32>
    %44 = tpu.iota {dimensions = array<i32: 1>} : vector<16x16xi32>
    %45 = arith.cmpi sle, %44, %43 : vector<16x16xi32>
    %46 = arith.truncf %35 : vector<16x128xf32> to vector<16x128xbf16>
    %c0_22 = arith.constant 0 : index
    %c0_23 = arith.constant 0 : index
    %c0_24 = arith.constant 0 : index
    %47 = vector.load %arg8[%c0_22, %c0_23, %c0_24] : memref<1x128x128xbf16, #tpu.memory_space<vmem>>, vector<1x128x128xbf16>
    %48 = vector.shape_cast %47 : vector<1x128x128xbf16> to vector<128x128xbf16>
    %49 = vector.extract_strided_slice %42 {offsets = [0, 0], sizes = [16, 32], strides = [1, 1]} : vector<16x64xf32> to vector<16x32xf32>
    %50 = arith.truncf %49 : vector<16x32xf32> to vector<16x32xbf16>
    %51 = vector.extract_strided_slice %28 {offsets = [0, 0], sizes = [16, 32], strides = [1, 1]} : vector<16x64xf32> to vector<16x32xf32>
    %52 = arith.truncf %51 : vector<16x32xf32> to vector<16x32xbf16>
    %53 = vector.extract_strided_slice %46 {offsets = [0, 0], sizes = [16, 32], strides = [1, 1]} : vector<16x128xbf16> to vector<16x32xbf16>
    %cst_25 = arith.constant dense<0.000000e+00> : vector<16x16xf32>
    %54 = tpu.matmul %53, %50, %cst_25 {dimension_numbers = #tpu.dot_dimension_numbers<[1], [1], [0], [0], [0, 0, 1, 0], [], []>} : vector<16x32xbf16>, vector<16x32xbf16>, vector<16x16xf32> -> vector<16x16xf32>
    %cst_26 = arith.constant -1.000000e+30 : f32
    %55 = vector.broadcast %cst_26 : f32 to vector<16x16xf32>
    %56 = arith.select %45, %54, %55 : vector<16x16xi1>, vector<16x16xf32>
    %cst_27 = arith.constant dense<0xFF800000> : vector<16xf32>
    %57 = vector.multi_reduction <maximumf>, %56, %cst_27 [1] : vector<16x16xf32> to vector<16xf32>
    %58 = vector.shape_cast %57 : vector<16xf32> to vector<16x1xf32>
    %59 = vector.broadcast %58 : vector<16x1xf32> to vector<16x16xf32>
    %60 = arith.subf %56, %59 : vector<16x16xf32>
    %61 = math.exp %60 : vector<16x16xf32>
    %cst_28 = arith.constant dense<0.000000e+00> : vector<16xf32>
    %62 = vector.multi_reduction <add>, %61, %cst_28 [1] : vector<16x16xf32> to vector<16xf32>
    %63 = vector.shape_cast %62 : vector<16xf32> to vector<16x1xf32>
    %64 = tpu.reciprocal %63 {approx = true} : vector<16x1xf32> -> vector<16x1xf32>
    %65 = vector.broadcast %64 : vector<16x1xf32> to vector<16x16xf32>
    %66 = arith.mulf %61, %65 : vector<16x16xf32>
    %67 = arith.truncf %66 : vector<16x16xf32> to vector<16x16xbf16>
    %cst_29 = arith.constant dense<0.000000e+00> : vector<16x32xf32>
    %68 = tpu.matmul %67, %52, %cst_29 {dimension_numbers = #tpu.dot_dimension_numbers<[1], [0], [0], [1], [0, 0, 1, 1], [], []>} : vector<16x16xbf16>, vector<16x32xbf16>, vector<16x32xf32> -> vector<16x32xf32>
    %69 = arith.truncf %68 : vector<16x32xf32> to vector<16x32xbf16>
    %70 = vector.extract_strided_slice %48 {offsets = [0, 0], sizes = [32, 128], strides = [1, 1]} : vector<128x128xbf16> to vector<32x128xbf16>
    %cst_30 = arith.constant dense<0.000000e+00> : vector<16x128xf32>
    %71 = tpu.matmul %69, %70, %cst_30 {dimension_numbers = #tpu.dot_dimension_numbers<[1], [0], [0], [1], [0, 0, 1, 1], [], []>} : vector<16x32xbf16>, vector<32x128xbf16>, vector<16x128xf32> -> vector<16x128xf32>
    %72 = arith.addf %3, %71 : vector<16x128xf32>
    %73 = vector.extract_strided_slice %46 {offsets = [0, 32], sizes = [16, 32], strides = [1, 1]} : vector<16x128xbf16> to vector<16x32xbf16>
    %cst_31 = arith.constant dense<0.000000e+00> : vector<16x16xf32>
    %74 = tpu.matmul %73, %50, %cst_31 {dimension_numbers = #tpu.dot_dimension_numbers<[1], [1], [0], [0], [0, 0, 1, 0], [], []>} : vector<16x32xbf16>, vector<16x32xbf16>, vector<16x16xf32> -> vector<16x16xf32>
    %cst_32 = arith.constant -1.000000e+30 : f32
    %75 = vector.broadcast %cst_32 : f32 to vector<16x16xf32>
    %76 = arith.select %45, %74, %75 : vector<16x16xi1>, vector<16x16xf32>
    %cst_33 = arith.constant dense<0xFF800000> : vector<16xf32>
    %77 = vector.multi_reduction <maximumf>, %76, %cst_33 [1] : vector<16x16xf32> to vector<16xf32>
    %78 = vector.shape_cast %77 : vector<16xf32> to vector<16x1xf32>
    %79 = vector.broadcast %78 : vector<16x1xf32> to vector<16x16xf32>
    %80 = arith.subf %76, %79 : vector<16x16xf32>
    %81 = math.exp %80 : vector<16x16xf32>
    %cst_34 = arith.constant dense<0.000000e+00> : vector<16xf32>
    %82 = vector.multi_reduction <add>, %81, %cst_34 [1] : vector<16x16xf32> to vector<16xf32>
    %83 = vector.shape_cast %82 : vector<16xf32> to vector<16x1xf32>
    %84 = tpu.reciprocal %83 {approx = true} : vector<16x1xf32> -> vector<16x1xf32>
    %85 = vector.broadcast %84 : vector<16x1xf32> to vector<16x16xf32>
    %86 = arith.mulf %81, %85 : vector<16x16xf32>
    %87 = arith.truncf %86 : vector<16x16xf32> to vector<16x16xbf16>
    %cst_35 = arith.constant dense<0.000000e+00> : vector<16x32xf32>
    %88 = tpu.matmul %87, %52, %cst_35 {dimension_numbers = #tpu.dot_dimension_numbers<[1], [0], [0], [1], [0, 0, 1, 1], [], []>} : vector<16x16xbf16>, vector<16x32xbf16>, vector<16x32xf32> -> vector<16x32xf32>
    %89 = arith.truncf %88 : vector<16x32xf32> to vector<16x32xbf16>
    %90 = vector.extract_strided_slice %48 {offsets = [32, 0], sizes = [32, 128], strides = [1, 1]} : vector<128x128xbf16> to vector<32x128xbf16>
    %cst_36 = arith.constant dense<0.000000e+00> : vector<16x128xf32>
    %91 = tpu.matmul %89, %90, %cst_36 {dimension_numbers = #tpu.dot_dimension_numbers<[1], [0], [0], [1], [0, 0, 1, 1], [], []>} : vector<16x32xbf16>, vector<32x128xbf16>, vector<16x128xf32> -> vector<16x128xf32>
    %92 = arith.addf %72, %91 : vector<16x128xf32>
    %93 = vector.extract_strided_slice %42 {offsets = [0, 32], sizes = [16, 32], strides = [1, 1]} : vector<16x64xf32> to vector<16x32xf32>
    %94 = arith.truncf %93 : vector<16x32xf32> to vector<16x32xbf16>
    %95 = vector.extract_strided_slice %28 {offsets = [0, 32], sizes = [16, 32], strides = [1, 1]} : vector<16x64xf32> to vector<16x32xf32>
    %96 = arith.truncf %95 : vector<16x32xf32> to vector<16x32xbf16>
    %97 = vector.extract_strided_slice %46 {offsets = [0, 64], sizes = [16, 32], strides = [1, 1]} : vector<16x128xbf16> to vector<16x32xbf16>
    %cst_37 = arith.constant dense<0.000000e+00> : vector<16x16xf32>
    %98 = tpu.matmul %97, %94, %cst_37 {dimension_numbers = #tpu.dot_dimension_numbers<[1], [1], [0], [0], [0, 0, 1, 0], [], []>} : vector<16x32xbf16>, vector<16x32xbf16>, vector<16x16xf32> -> vector<16x16xf32>
    %cst_38 = arith.constant -1.000000e+30 : f32
    %99 = vector.broadcast %cst_38 : f32 to vector<16x16xf32>
    %100 = arith.select %45, %98, %99 : vector<16x16xi1>, vector<16x16xf32>
    %cst_39 = arith.constant dense<0xFF800000> : vector<16xf32>
    %101 = vector.multi_reduction <maximumf>, %100, %cst_39 [1] : vector<16x16xf32> to vector<16xf32>
    %102 = vector.shape_cast %101 : vector<16xf32> to vector<16x1xf32>
    %103 = vector.broadcast %102 : vector<16x1xf32> to vector<16x16xf32>
    %104 = arith.subf %100, %103 : vector<16x16xf32>
    %105 = math.exp %104 : vector<16x16xf32>
    %cst_40 = arith.constant dense<0.000000e+00> : vector<16xf32>
    %106 = vector.multi_reduction <add>, %105, %cst_40 [1] : vector<16x16xf32> to vector<16xf32>
    %107 = vector.shape_cast %106 : vector<16xf32> to vector<16x1xf32>
    %108 = tpu.reciprocal %107 {approx = true} : vector<16x1xf32> -> vector<16x1xf32>
    %109 = vector.broadcast %108 : vector<16x1xf32> to vector<16x16xf32>
    %110 = arith.mulf %105, %109 : vector<16x16xf32>
    %111 = arith.truncf %110 : vector<16x16xf32> to vector<16x16xbf16>
    %cst_41 = arith.constant dense<0.000000e+00> : vector<16x32xf32>
    %112 = tpu.matmul %111, %96, %cst_41 {dimension_numbers = #tpu.dot_dimension_numbers<[1], [0], [0], [1], [0, 0, 1, 1], [], []>} : vector<16x16xbf16>, vector<16x32xbf16>, vector<16x32xf32> -> vector<16x32xf32>
    %113 = arith.truncf %112 : vector<16x32xf32> to vector<16x32xbf16>
    %114 = vector.extract_strided_slice %48 {offsets = [64, 0], sizes = [32, 128], strides = [1, 1]} : vector<128x128xbf16> to vector<32x128xbf16>
    %cst_42 = arith.constant dense<0.000000e+00> : vector<16x128xf32>
    %115 = tpu.matmul %113, %114, %cst_42 {dimension_numbers = #tpu.dot_dimension_numbers<[1], [0], [0], [1], [0, 0, 1, 1], [], []>} : vector<16x32xbf16>, vector<32x128xbf16>, vector<16x128xf32> -> vector<16x128xf32>
    %116 = arith.addf %92, %115 : vector<16x128xf32>
    %117 = vector.extract_strided_slice %46 {offsets = [0, 96], sizes = [16, 32], strides = [1, 1]} : vector<16x128xbf16> to vector<16x32xbf16>
    %cst_43 = arith.constant dense<0.000000e+00> : vector<16x16xf32>
    %118 = tpu.matmul %117, %94, %cst_43 {dimension_numbers = #tpu.dot_dimension_numbers<[1], [1], [0], [0], [0, 0, 1, 0], [], []>} : vector<16x32xbf16>, vector<16x32xbf16>, vector<16x16xf32> -> vector<16x16xf32>
    %cst_44 = arith.constant -1.000000e+30 : f32
    %119 = vector.broadcast %cst_44 : f32 to vector<16x16xf32>
    %120 = arith.select %45, %118, %119 : vector<16x16xi1>, vector<16x16xf32>
    %cst_45 = arith.constant dense<0xFF800000> : vector<16xf32>
    %121 = vector.multi_reduction <maximumf>, %120, %cst_45 [1] : vector<16x16xf32> to vector<16xf32>
    %122 = vector.shape_cast %121 : vector<16xf32> to vector<16x1xf32>
    %123 = vector.broadcast %122 : vector<16x1xf32> to vector<16x16xf32>
    %124 = arith.subf %120, %123 : vector<16x16xf32>
    %125 = math.exp %124 : vector<16x16xf32>
    %cst_46 = arith.constant dense<0.000000e+00> : vector<16xf32>
    %126 = vector.multi_reduction <add>, %125, %cst_46 [1] : vector<16x16xf32> to vector<16xf32>
    %127 = vector.shape_cast %126 : vector<16xf32> to vector<16x1xf32>
    %128 = tpu.reciprocal %127 {approx = true} : vector<16x1xf32> -> vector<16x1xf32>
    %129 = vector.broadcast %128 : vector<16x1xf32> to vector<16x16xf32>
    %130 = arith.mulf %125, %129 : vector<16x16xf32>
    %131 = arith.truncf %130 : vector<16x16xf32> to vector<16x16xbf16>
    %cst_47 = arith.constant dense<0.000000e+00> : vector<16x32xf32>
    %132 = tpu.matmul %131, %96, %cst_47 {dimension_numbers = #tpu.dot_dimension_numbers<[1], [0], [0], [1], [0, 0, 1, 1], [], []>} : vector<16x16xbf16>, vector<16x32xbf16>, vector<16x32xf32> -> vector<16x32xf32>
    %133 = arith.truncf %132 : vector<16x32xf32> to vector<16x32xbf16>
    %134 = vector.extract_strided_slice %48 {offsets = [96, 0], sizes = [32, 128], strides = [1, 1]} : vector<128x128xbf16> to vector<32x128xbf16>
    %cst_48 = arith.constant dense<0.000000e+00> : vector<16x128xf32>
    %135 = tpu.matmul %133, %134, %cst_48 {dimension_numbers = #tpu.dot_dimension_numbers<[1], [0], [0], [1], [0, 0, 1, 1], [], []>} : vector<16x32xbf16>, vector<32x128xbf16>, vector<16x128xf32> -> vector<16x128xf32>
    %136 = arith.addf %116, %135 : vector<16x128xf32>
    %c0_49 = arith.constant 0 : index
    %c0_50 = arith.constant 0 : index
    %c0_51 = arith.constant 0 : index
    %137 = vector.load %arg9[%c0_49, %c0_50, %c0_51] : memref<1x1x128xf32, #tpu.memory_space<vmem>>, vector<1x1x128xf32>
    %138 = vector.shape_cast %137 : vector<1x1x128xf32> to vector<1x128xf32>
    %139 = arith.mulf %136, %136 : vector<16x128xf32>
    %cst_52 = arith.constant dense<0.000000e+00> : vector<16xf32>
    %140 = vector.multi_reduction <add>, %139, %cst_52 [1] : vector<16x128xf32> to vector<16xf32>
    %141 = vector.shape_cast %140 : vector<16xf32> to vector<16x1xf32>
    %cst_53 = arith.constant 1.280000e+02 : f32
    %142 = vector.broadcast %cst_53 : f32 to vector<16x1xf32>
    %143 = arith.divf %141, %142 : vector<16x1xf32>
    %cst_54 = arith.constant 9.99999997E-7 : f32
    %144 = vector.broadcast %cst_54 : f32 to vector<16x1xf32>
    %145 = arith.addf %143, %144 : vector<16x1xf32>
    %146 = math.rsqrt %145 : vector<16x1xf32>
    %147 = vector.broadcast %146 : vector<16x1xf32> to vector<16x128xf32>
    %148 = arith.mulf %136, %147 : vector<16x128xf32>
    %149 = vector.broadcast %138 : vector<1x128xf32> to vector<16x128xf32>
    %150 = arith.mulf %148, %149 : vector<16x128xf32>
    %151 = arith.truncf %150 : vector<16x128xf32> to vector<16x128xbf16>
    %c0_55 = arith.constant 0 : index
    %c0_56 = arith.constant 0 : index
    %c0_57 = arith.constant 0 : index
    %152 = vector.load %arg10[%c0_55, %c0_56, %c0_57] : memref<1x128x512xbf16, #tpu.memory_space<vmem>>, vector<1x128x512xbf16>
    %153 = vector.shape_cast %152 : vector<1x128x512xbf16> to vector<128x512xbf16>
    %cst_58 = arith.constant dense<0.000000e+00> : vector<16x512xf32>
    %154 = tpu.matmul %151, %153, %cst_58 {dimension_numbers = #tpu.dot_dimension_numbers<[1], [0], [0], [1], [0, 0, 1, 1], [], []>} : vector<16x128xbf16>, vector<128x512xbf16>, vector<16x512xf32> -> vector<16x512xf32>
    %155 = vector.extract_strided_slice %154 {offsets = [0, 0], sizes = [16, 256], strides = [1, 1]} : vector<16x512xf32> to vector<16x256xf32>
    %156 = vector.extract_strided_slice %154 {offsets = [0, 256], sizes = [16, 256], strides = [1, 1]} : vector<16x512xf32> to vector<16x256xf32>
    %157 = arith.negf %155 : vector<16x256xf32>
    %158 = math.exp %157 : vector<16x256xf32>
    %cst_59 = arith.constant 1.000000e+00 : f32
    %159 = vector.broadcast %cst_59 : f32 to vector<16x256xf32>
    %160 = arith.addf %159, %158 : vector<16x256xf32>
    %161 = arith.divf %159, %160 : vector<16x256xf32>
    %162 = arith.mulf %155, %161 : vector<16x256xf32>
    %163 = arith.mulf %162, %156 : vector<16x256xf32>
    %164 = arith.truncf %163 : vector<16x256xf32> to vector<16x256xbf16>
    %c0_60 = arith.constant 0 : index
    %c0_61 = arith.constant 0 : index
    %c0_62 = arith.constant 0 : index
    %165 = vector.load %arg11[%c0_60, %c0_61, %c0_62] : memref<1x256x128xbf16, #tpu.memory_space<vmem>>, vector<1x256x128xbf16>
    %166 = vector.shape_cast %165 : vector<1x256x128xbf16> to vector<256x128xbf16>
    %cst_63 = arith.constant dense<0.000000e+00> : vector<16x128xf32>
    %167 = tpu.matmul %164, %166, %cst_63 {dimension_numbers = #tpu.dot_dimension_numbers<[1], [0], [0], [1], [0, 0, 1, 1], [], []>} : vector<16x256xbf16>, vector<256x128xbf16>, vector<16x128xf32> -> vector<16x128xf32>
    %168 = arith.addf %167, %136 : vector<16x128xf32>
    %c0_64 = arith.constant 0 : index
    %c0_65 = arith.constant 0 : index
    %169 = vector.load %arg14[%c0_64, %c0_65] : memref<16x128xf32, #tpu.memory_space<vmem>>, vector<16x128xf32>
    tpu.vector_store %arg14[%c0_64, %c0_65], %168 {strides = array<i32>} : memref<16x128xf32, #tpu.memory_space<vmem>>, vector<16x128xf32>,
    %c1_i32 = arith.constant 1 : i32
    %170 = arith.cmpi eq, %arg0, %c1_i32 : i32
    %171 = arith.extui %170 : i1 to i32
    %c0_i32_66 = arith.constant 0 : i32
    %172 = arith.cmpi ne, %171, %c0_i32_66 : i32
    scf.if %172 {
      %c0_67 = arith.constant 0 : index
      %c0_68 = arith.constant 0 : index
      %173 = vector.load %arg12[%c0_67, %c0_68] : memref<1x128xf32, #tpu.memory_space<vmem>>, vector<1x128xf32>
      %174 = arith.mulf %168, %168 : vector<16x128xf32>
      %cst_69 = arith.constant dense<0.000000e+00> : vector<16xf32>
      %175 = vector.multi_reduction <add>, %174, %cst_69 [1] : vector<16x128xf32> to vector<16xf32>
      %176 = vector.shape_cast %175 : vector<16xf32> to vector<16x1xf32>
      %cst_70 = arith.constant 1.280000e+02 : f32
      %177 = vector.broadcast %cst_70 : f32 to vector<16x1xf32>
      %178 = arith.divf %176, %177 : vector<16x1xf32>
      %cst_71 = arith.constant 9.99999997E-7 : f32
      %179 = vector.broadcast %cst_71 : f32 to vector<16x1xf32>
      %180 = arith.addf %178, %179 : vector<16x1xf32>
      %181 = math.rsqrt %180 : vector<16x1xf32>
      %182 = vector.broadcast %181 : vector<16x1xf32> to vector<16x128xf32>
      %183 = arith.mulf %168, %182 : vector<16x128xf32>
      %184 = vector.broadcast %173 : vector<1x128xf32> to vector<16x128xf32>
      %185 = arith.mulf %183, %184 : vector<16x128xf32>
      %c0_72 = arith.constant 0 : index
      %c0_73 = arith.constant 0 : index
      %186 = vector.load %arg13[%c0_72, %c0_73] : memref<16x128xf32, #tpu.memory_space<vmem>>, vector<16x128xf32>
      tpu.vector_store %arg13[%c0_72, %c0_73], %185 {strides = array<i32>} : memref<16x128xf32, #tpu.memory_space<vmem>>, vector<16x128xf32>,
    } else {
    }
    return
  }
  func.func @transform_0(%arg0: i32) -> (i32, i32) {
    %c0_i32 = arith.constant 0 : i32
    %c0_i32_0 = arith.constant 0 : i32
    %c0_i32_1 = arith.constant 0 : i32
    return %c0_i32, %c0_i32_0 : i32, i32
  }
  func.func @transform_1(%arg0: i32) -> (i32, i32) {
    %c0_i32 = arith.constant 0 : i32
    %c0_i32_0 = arith.constant 0 : i32
    %c0_i32_1 = arith.constant 0 : i32
    return %c0_i32, %c0_i32_0 : i32, i32
  }
  func.func @transform_2(%arg0: i32) -> (i32, i32) {
    %c0_i32 = arith.constant 0 : i32
    %c0_i32_0 = arith.constant 0 : i32
    %c0_i32_1 = arith.constant 0 : i32
    return %c0_i32, %c0_i32_0 : i32, i32
  }
  func.func @transform_3(%arg0: i32) -> (i32, i32) {
    %c0_i32 = arith.constant 0 : i32
    %c0_i32_0 = arith.constant 0 : i32
    %c0_i32_1 = arith.constant 0 : i32
    return %c0_i32, %c0_i32_0 : i32, i32
  }
  func.func @transform_4(%arg0: i32) -> (i32, i32, i32) {
    %c0_i32 = arith.constant 0 : i32
    %c0_i32_0 = arith.constant 0 : i32
    %c0_i32_1 = arith.constant 0 : i32
    return %arg0, %c0_i32, %c0_i32_0 : i32, i32, i32
  }
  func.func @transform_5(%arg0: i32) -> (i32, i32, i32) {
    %c0_i32 = arith.constant 0 : i32
    %c0_i32_0 = arith.constant 0 : i32
    %c0_i32_1 = arith.constant 0 : i32
    return %arg0, %c0_i32, %c0_i32_0 : i32, i32, i32
  }
  func.func @transform_6(%arg0: i32) -> (i32, i32, i32) {
    %c0_i32 = arith.constant 0 : i32
    %c0_i32_0 = arith.constant 0 : i32
    %c0_i32_1 = arith.constant 0 : i32
    return %arg0, %c0_i32, %c0_i32_0 : i32, i32, i32
  }
  func.func @transform_7(%arg0: i32) -> (i32, i32, i32) {
    %c0_i32 = arith.constant 0 : i32
    %c0_i32_0 = arith.constant 0 : i32
    %c0_i32_1 = arith.constant 0 : i32
    return %arg0, %c0_i32, %c0_i32_0 : i32, i32, i32
  }
  func.func @transform_8(%arg0: i32) -> (i32, i32, i32) {
    %c0_i32 = arith.constant 0 : i32
    %c0_i32_0 = arith.constant 0 : i32
    %c0_i32_1 = arith.constant 0 : i32
    return %arg0, %c0_i32, %c0_i32_0 : i32, i32, i32
  }
  func.func @transform_9(%arg0: i32) -> (i32, i32, i32) {
    %c0_i32 = arith.constant 0 : i32
    %c0_i32_0 = arith.constant 0 : i32
    %c0_i32_1 = arith.constant 0 : i32
    return %arg0, %c0_i32, %c0_i32_0 : i32, i32, i32
  }
  func.func @transform_10(%arg0: i32) -> (i32, i32, i32) {
    %c0_i32 = arith.constant 0 : i32
    %c0_i32_0 = arith.constant 0 : i32
    %c0_i32_1 = arith.constant 0 : i32
    return %arg0, %c0_i32, %c0_i32_0 : i32, i32, i32
  }
  func.func @transform_11(%arg0: i32) -> (i32, i32) {
    %c0_i32 = arith.constant 0 : i32
    %c0_i32_0 = arith.constant 0 : i32
    %c0_i32_1 = arith.constant 0 : i32
    return %c0_i32, %c0_i32_0 : i32, i32
  }
  func.func @transform_12(%arg0: i32) -> (i32, i32) {
    %c0_i32 = arith.constant 0 : i32
    %c0_i32_0 = arith.constant 0 : i32
    %c0_i32_1 = arith.constant 0 : i32
    return %c0_i32, %c0_i32_0 : i32, i32
  }
}

</mosaic_0001>

<bundles_post_ra>
// kernel: tile.19
= control target key start
LH: loop header
LB: loop body
LE: loop exit
PB: predicated region body
PF: predicated region fallthrough
CT: control target
= control target key end

     0   :  { %vm68_vm0 = vcmask 1047556   ;;  %s167_s9 = smov 64   ;;  %s168_s10 = smov 32   ;;  %vm70_vm1 = vcmask 261120   ;;  %vm89_vm2 = vcmask 1048320   ;;  %vm110_vm3 = vcmask 785920   ;;  %s259_s0 = inlined_call_operand.vmem [shape: f32[16,4,32], index: 0, kind: input, shape index: {}]   ;;  %s260_s1 = inlined_call_operand.vmem [shape: f32[16,128], index: 1, kind: output, shape index: {}]  }
   0x1   :  { %v152_v0 = vld [vmem:[%s259_s0 + $0x1c] sm:$0xf]  ;;  %v153_v1 = vld [vmem:[%s259_s0 + $0x18] sm:$0xf]  ;;  %v154_v2 = vld [vmem:[%s259_s0 + $0x14] sm:$0xf] }
   0x2   :  { %39 = vst [vmem:[#allocation0 + $0x38] sm:$0xf] %v152_v0  ;;  %v155_v3 = vld [vmem:[%s259_s0 + $0x10] sm:$0xf]  ;;  %v156_v4 = vld [vmem:[%s259_s0 + $0xc] sm:$0xf] }
   0x3   :  { %43 = vst [vmem:[#allocation0 + $0x30] sm:$0xf] %v153_v1  ;;  %v157_v5 = vld [vmem:[%s259_s0 + $0x8] sm:$0xf]  ;;  %v158_v6 = vld [vmem:[%s259_s0 + $0x4] sm:$0xf] }
   0x4   :  { %47 = vst [vmem:[#allocation0 + $0x28] sm:$0xf] %v154_v2  ;;  %v64_v7 = vld [vmem:[%s259_s0] sm:$0xf]  ;;  %v144_v8 = vld [vmem:[%s259_s0 + $0x3c] sm:$0xf] }
   0x5   :  { %51 = vst [vmem:[#allocation0 + $0x20] sm:$0xf] %v155_v3  ;;  %v145_v9 = vld [vmem:[%s259_s0 + $0x38] sm:$0xf]  ;;  %v146_v10 = vld [vmem:[%s259_s0 + $0x34] sm:$0xf] }
   0x6   :  { %55 = vst [vmem:[#allocation0 + $0x18] sm:$0xf] %v156_v4  ;;  %v147_v11 = vld [vmem:[%s259_s0 + $0x30] sm:$0xf]  ;;  %v148_v12 = vld [vmem:[%s259_s0 + $0x2c] sm:$0xf] }
   0x7   :  { %59 = vst [vmem:[#allocation0 + $0x10] sm:$0xf] %v157_v5  ;;  %v149_v13 = vld [vmem:[%s259_s0 + $0x28] sm:$0xf]  ;;  %v150_v15 = vld [vmem:[%s259_s0 + $0x24] sm:$0xf] }
   0x8   :  { %63 = vst [vmem:[#allocation0 + $0x8] sm:$0xf] %v158_v6  ;;  %v151_v17 = vld [vmem:[%s259_s0 + $0x20] sm:$0xf]  ;;  %s166_s0 = smov 96   ;;  %vm131_vm4 = vcmask 523520  }
   0x9   :  { %65 = vst [vmem:[#allocation0] sm:$0xf] %v64_v7 }
   0xa   :  { %7 = vst [vmem:[#allocation0 + $0x78] sm:$0xf] %v144_v8 }
   0xb   :  { %11 = vst [vmem:[#allocation0 + $0x70] sm:$0xf] %v145_v9 }
   0xc   :  { %v84_v14 = vld [vmem:[#allocation0 + $0x3] ss:$8 sm:$0xf0]   ;;  %15 = vst [vmem:[#allocation0 + $0x68] sm:$0xf] %v146_v10 }
   0xd   :  { %v105_v16 = vld [vmem:[#allocation0 + $0x2] ss:$8 sm:$0xf0]   ;;  %19 = vst [vmem:[#allocation0 + $0x60] sm:$0xf] %v147_v11 }
   0xe   :  { %23 = vst [vmem:[#allocation0 + $0x58] sm:$0xf] %v148_v12  ;;  %v126_v18 = vld [vmem:[#allocation0 + $0x1] ss:$8 sm:$0xf0]  }
   0xf   :  { %27 = vst [vmem:[#allocation0 + $0x50] sm:$0xf] %v149_v13  ;;  %v67_v35 = vld [vmem:[#allocation0] ss:$8 sm:$0xf0]  }
  0x10   :  { %v82_v19 = vld [vmem:[#allocation0 + $0x3] ss:$8 sm:$0xf]   ;;  %v103_v20 = vld [vmem:[#allocation0 + $0x2] ss:$8 sm:$0xf]  }
  0x11   :  { %v86_v21 = vsel %vm68_vm0, %v84_v14, %v82_v19  ;;  %v107_v22 = vsel %vm68_vm0, %v105_v16, %v103_v20  ;;  %v124_v23 = vld [vmem:[#allocation0 + $0x1] ss:$8 sm:$0xf]   ;;  %31 = vst [vmem:[#allocation0 + $0x48] sm:$0xf] %v150_v15 }
  0x12   :  { %87 = vrot.lane.b32.xlu0 %v86_v21, %s166_s0  ;;  %108 = vrot.lane.b32.xlu1 %v107_v22, %s167_s9  ;;  %v128_v24 = vsel %vm68_vm0, %v126_v18, %v124_v23  ;;  %35 = vst [vmem:[#allocation0 + $0x40] sm:$0xf] %v151_v17  ;;  %v66_v34 = vld [vmem:[#allocation0] ss:$8 sm:$0xf]  }
  0x13   :  { %129 = vrot.lane.b32.xlu2 %v128_v24, %s168_s10  ;;  %v69_v36 = vsel %vm68_vm0, %v67_v35, %v66_v34 }
  0x14   :  { %v94_v25 = vld [vmem:[#allocation0 + $0x43] ss:$8 sm:$0xf0]   ;;  %v115_v26 = vld [vmem:[#allocation0 + $0x42] ss:$8 sm:$0xf0]  }
  0x15   :  { %v136_v27 = vld [vmem:[#allocation0 + $0x41] ss:$8 sm:$0xf0]   ;;  %71 = vst.msk [vmem:[%s260_s1] sm:$0xff] %vm70_vm1, %v69_v36  }
  0x16   :  { %v75_v38 = vld [vmem:[#allocation0 + $0x40] ss:$8 sm:$0xf0]  }
  0x19   :  { %v92_v28 = vld [vmem:[#allocation0 + $0x43] ss:$8 sm:$0xf]   ;;  %v113_v29 = vld [vmem:[#allocation0 + $0x42] ss:$8 sm:$0xf]  }
  0x1a   :  { %v96_v30 = vsel %vm68_vm0, %v94_v25, %v92_v28  ;;  %v117_v31 = vsel %vm68_vm0, %v115_v26, %v113_v29  ;;  %v134_v32 = vld [vmem:[#allocation0 + $0x41] ss:$8 sm:$0xf]   ;;  %v73_v37 = vld [vmem:[#allocation0 + $0x40] ss:$8 sm:$0xf]  }
  0x1b   :  { %97 = vrot.lane.b32.xlu0 %v96_v30, %s166_s0  ;;  %118 = vrot.lane.b32.xlu1 %v117_v31, %s167_s9  ;;  %v138_v33 = vsel %vm68_vm0, %v136_v27, %v134_v32  ;;  %v77_v40 = vsel %vm68_vm0, %v75_v38, %v73_v37 }
  0x1c   :  { %139 = vrot.lane.b32.xlu2 %v138_v33, %s168_s10  ;;  %159 = vst.msk [vmem:[%s260_s1 + $0x8] sm:$0xff] %vm70_vm1, %v77_v40  }
  0x6d   :  { %v130_v39 = vpop.permute.xlu2 %129  }
  0x76   :  { %v140_v41 = vpop.permute.xlu2 %139  }
  0x84   :  { %v88_v42 = vpop.permute.xlu0 %87   ;;  %v109_v43 = vpop.permute.xlu1 %108  }
  0x85   :  { %90 = vst.msk [vmem:[%s260_s1] sm:$0xff] %vm89_vm2, %v88_v42  }
  0x86   :  { %111 = vst.msk [vmem:[%s260_s1] sm:$0xff] %vm110_vm3, %v109_v43  }
  0x87   :  { %132 = vst.msk [vmem:[%s260_s1] sm:$0xff] %vm131_vm4, %v130_v39  }
  0x8d   :  { %v98_v44 = vpop.permute.xlu0 %97   ;;  %v119_v45 = vpop.permute.xlu1 %118  }
  0x8e   :  { %160 = vst.msk [vmem:[%s260_s1 + $0x8] sm:$0xff] %vm89_vm2, %v98_v44  }
  0x8f   :  { %161 = vst.msk [vmem:[%s260_s1 + $0x8] sm:$0xff] %vm110_vm3, %v119_v45  }
  0x90   :  { %162 = vst.msk [vmem:[%s260_s1 + $0x8] sm:$0xff] %vm131_vm4, %v140_v41  }

// kernel: cgm_qwen2_forward.1
= control target key start
LH: loop header
LB: loop body
LE: loop exit
PB: predicated region body
PF: predicated region fallthrough
CT: control target
= control target key end

     0   :  { %s2898_s0 = inlined_call_operand.vmem [shape: f32[16,128], index: 0, kind: input, shape index: {}]   ;;  %s2899_s1 = inlined_call_operand.vmem [shape: f32[16,128], index: 1, kind: input, shape index: {}]   ;;  %s2900_s2 = inlined_call_operand.vmem [shape: f32[16,128], index: 2, kind: input, shape index: {}]   ;;  %s2901_s3 = inlined_call_operand.vmem [shape: f32[128,128], index: 3, kind: input, shape index: {}]   ;;  %s2902_s4 = inlined_call_operand.vmem [shape: f32[2,1,128], index: 4, kind: input, shape index: {}]   ;;  %s2903_s5 = inlined_call_operand.vmem [shape: bf16[2,128,256], index: 5, kind: input, shape index: {}]   ;;  %s2904_s6 = inlined_call_operand.vmem [shape: f32[2,1,256], index: 6, kind: input, shape index: {}]   ;;  %s2905_s7 = inlined_call_operand.vmem [shape: bf16[2,128,128], index: 7, kind: input, shape index: {}]   ;;  %s2906_s8 = inlined_call_operand.vmem [shape: f32[2,1,128], index: 8, kind: input, shape index: {}]   ;;  %s2907_s9 = inlined_call_operand.vmem [shape: bf16[2,128,512], index: 9, kind: input, shape index: {}]   ;;  %s2908_s10 = inlined_call_operand.vmem [shape: bf16[2,256,128], index: 10, kind: input, shape index: {}]   ;;  %s2909_s11 = inlined_call_operand.vmem [shape: f32[1,128], index: 11, kind: input, shape index: {}]   ;;  %s2910_s12 = inlined_call_operand.hbm [shape: f32[16,128], index: 12, kind: output, shape index: {}]  }
   0x1   :  { %2912 = sst [smem:[#allocation7_spill]] %s2903_s5 }
   0x2   :  { %2913 = sst [smem:[#allocation8_spill]] %s2910_s12 }
   0x3   :  { %17 = vsyncpa [#allocation4], 0  ;;  %s2487_s21 = smov 0  }
   0x4 LB: > { %2914 = sst [smem:[#allocation6_spill]] %s2413_s21  ;;  %s2493_s22 = sadd.s32 4294967295, %s2413_s21   ;;  %s2413_s21 = sphi %s2487_s21, %s23_s21  }
   0x5   : > { %p1891_p0 = scmp.ge.s32.totalorder %s2413_s21, 1  ;;  %p413_p1 = scmp.lt.s32.totalorder %s2413_s21, 3 }
   0x7   : > { %p414_p2 = pnand %p1891_p0, %p413_p1 }
   0x8   : > { %p475_p3 = scmp.lt.s32.totalorder (!%p414_p2), %s2493_s22, 1  ;;  %s2915_s5 = sld [smem:[#allocation7_spill]] (!%p414_p2) }
   0x9   : > { %417 = sbr.rel (%p414_p2) target bundleno = 2440 (0x988), region = 68  ;;  %p1901_p4 = scmp.ne.s32.totalorder (!%p414_p2), %s2493_s22, 0 }
   0xe   : > { %s2499_s23 = scalar_select %p475_p3, %s2493_s22, 1 }
  0x10   : > { %s2213_s27 = sshll.u32 %s2499_s23, 7  ;;  %s1894_s13 = sshll.u32 %s2499_s23, 1 }
  0x11   : > { %s2509_s30 = scalar_lea.vmem %s2915_s5, %s2213_s27  ;;  %s2515_s16 = scalar_lea.vmem %s2904_s6, %s1894_s13 }
  0x12   : > { %s2214_s17 = sshll.u32 %s2499_s23, 6  ;;  %s494_s26 = scalar_lea.vmem %s2906_s8, %s2499_s23 }
  0x13   : > { %s2521_s20 = scalar_lea.vmem %s2905_s7, %s2214_s17  ;;  %s2215_s21 = sshll.u32 %s2499_s23, 8 }
  0x14   : > { %s2531_s5 = scalar_lea.vmem %s2908_s10, %s2213_s27  ;;  %s2536_s13 = scalar_lea.vmem %s2907_s9, %s2215_s21 }
  0x15   : > { %509 = sbr.rel (%p1901_p4) target bundleno = 29 (0x1d), region = 72 }
  0x1a   : > { %v510_v0 = vld [vmem:[%s2898_s0] sm:$0xff]  ;;  %v511_v1 = vld [vmem:[%s2898_s0 + $0x8] sm:$0xff] }
  0x1b   : > { %512 = vst [vmem:[#allocation2] sm:$0xff] %v510_v0 }
  0x1c   : > { %513 = vst [vmem:[#allocation2 + $0x8] sm:$0xff] %v511_v1 }
  0x1d PF: > { %v1960_v6 = vld [vmem:[%s2509_s30 + $0x70] sm:$0xf]  ;;  %v2232_v7 = vld [vmem:[%s2509_s30 + $0x74] sm:$0xf0]  ;;  %v2231_v8 = vld [vmem:[%s2509_s30 + $0x74] sm:$0xf] }
  0x1e   : > { %v1961_v9 = vor.u32 %v2232_v7, %v1960_v6  ;;  %v1962_v10 = vld [vmem:[%s2509_s30 + $0x78] sm:$0xf0]  ;;  %v2415_v11 = vmov 128.0   ;;  %v1952_v13 = vld [vmem:[%s2509_s30 + $0x60] sm:$0xf]  ;;  %v710_v1 = vld [vmem:[%s2901_s3 + $0x70] sm:$0xff] }
  0x1f   : > { %2312 = vrcp.f32 %v2415_v11  ;;  %v1965_v12 = vor.u32 %v2231_v8, %v1962_v10  ;;  %v2230_v14 = vld [vmem:[%s2509_s30 + $0x64] sm:$0xf0]  ;;  %v2229_v15 = vld [vmem:[%s2509_s30 + $0x64] sm:$0xf]  ;;  %v1954_v17 = vld [vmem:[%s2509_s30 + $0x68] sm:$0xf0] }
  0x20   : > { %664 = vmatpush.bf16.msra.mxu0 %v1961_v9  ;;  %v1953_v16 = vor.u32 %v2230_v14, %v1952_v13  ;;  %v1957_v18 = vor.u32 %v2229_v15, %v1954_v17  ;;  %v1944_v20 = vld [vmem:[%s2509_s30 + $0x50] sm:$0xf]  ;;  %v2228_v21 = vld [vmem:[%s2509_s30 + $0x54] sm:$0xf0]  ;;  %v2227_v22 = vld [vmem:[%s2509_s30 + $0x54] sm:$0xf] }
  0x21   : > { %678 = vmatpush.bf16.msra.mxu1 %v1965_v12  ;;  %v1945_v23 = vor.u32 %v2228_v21, %v1944_v20  ;;  %v1946_v24 = vld [vmem:[%s2509_s30 + $0x58] sm:$0xf0]  ;;  %v1936_v27 = vld [vmem:[%s2509_s30 + $0x40] sm:$0xf]  ;;  %v2226_v28 = vld [vmem:[%s2509_s30 + $0x44] sm:$0xf0] }
  0x22   : > { %v2545_v2 = vld [vmem:[#allocation2] sm:$0xff]  ;;  %v1949_v25 = vor.u32 %v2227_v22, %v1946_v24  ;;  %v1937_v30 = vor.u32 %v2226_v28, %v1936_v27  ;;  %v1938_v31 = vld [vmem:[%s2509_s30 + $0x48] sm:$0xf0]  ;;  %v1928_v34 = vld [vmem:[%s2509_s30 + $0x30] sm:$0xf]  ;;  %vm743_vm7 = vcmask 523264  }
  0x23   : > { %v517_v3 = vmul.f32 %v2545_v2, %v2545_v2  ;;  %v2549_v4 = vld [vmem:[#allocation2 + $0x8] sm:$0xff]  ;;  %v2225_v29 = vld [vmem:[%s2509_s30 + $0x44] sm:$0xf]  ;;  %v2224_v35 = vld [vmem:[%s2509_s30 + $0x34] sm:$0xf0]  ;;  %vm809_vm8 = vcmask 261120  }
  0x24   : > { %v518_v5 = vmul.f32 %v2549_v4, %v2549_v4  ;;  %665 = vmatpush.bf16.msra.mxu0 %v1953_v16  ;;  %v1941_v32 = vor.u32 %v2225_v29, %v1938_v31  ;;  %v2223_v36 = vld [vmem:[%s2509_s30 + $0x34] sm:$0xf]  ;;  %v1929_v37 = vor.u32 %v2224_v35, %v1928_v34  ;;  %v1930_v38 = vld [vmem:[%s2509_s30 + $0x38] sm:$0xf0]  ;;  %v1920_v41 = vld [vmem:[%s2509_s30 + $0x20] sm:$0xf] }
  0x25   : > { %519 = vadd.xlane.f32.xlu0 %v517_v3  ;;  %v2313_v19 = vpop.eup %2312  ;;  %679 = vmatpush.bf16.msra.mxu1 %v1957_v18  ;;  %v1933_v39 = vor.u32 %v2223_v36, %v1930_v38  ;;  %v2222_v42 = vld [vmem:[%s2509_s30 + $0x24] sm:$0xf0]  ;;  %v2221_v43 = vld [vmem:[%s2509_s30 + $0x24] sm:$0xf]  ;;  %v1922_v45 = vld [vmem:[%s2509_s30 + $0x28] sm:$0xf0] }
  0x26   : > { %v524_v26 = vmul.f32 128.0, %v2313_v19  ;;  %v1921_v44 = vor.u32 %v2222_v42, %v1920_v41  ;;  %v1925_v46 = vor.u32 %v2221_v43, %v1922_v45  ;;  %vm528_vm0 = vweird.f32 %v2313_v19  ;;  %v1912_v48 = vld [vmem:[%s2509_s30 + $0x10] sm:$0xf]  ;;  %v2220_v49 = vld [vmem:[%s2509_s30 + $0x14] sm:$0xf0]  ;;  %v709_v3 = vld [vmem:[%s2901_s3 + $0x68] sm:$0xff] }
  0x27   : > { %v2219_v50 = vld [vmem:[%s2509_s30 + $0x14] sm:$0xf]  ;;  %v1913_v51 = vor.u32 %v2220_v49, %v1912_v48  ;;  %v1914_v52 = vld [vmem:[%s2509_s30 + $0x18] sm:$0xf0]  ;;  %v1904_v53 = vld [vmem:[%s2509_s30] sm:$0xf] }
  0x28   : > { %666 = vmatpush.bf16.msra.mxu0 %v1945_v23  ;;  %v525_v33 = vsub.f32 1.0, %v524_v26  ;;  %v2218_v54 = vld [vmem:[%s2509_s30 + $0x4] sm:$0xf0]  ;;  %v1917_v55 = vor.u32 %v2219_v50, %v1914_v52  ;;  %v2217_v56 = vld [vmem:[%s2509_s30 + $0x4] sm:$0xf]  ;;  %v711_v0 = vld [vmem:[%s2901_s3 + $0x78] sm:$0xff] }
  0x29   : > { %680 = vmatpush.bf16.msra.mxu1 %v1949_v25  ;;  %v1906_v57 = vld [vmem:[%s2509_s30 + $0x8] sm:$0xf0]  ;;  %v1905_v59 = vor.u32 %v2218_v54, %v1904_v53  ;;  %714 = vmatpush.msra.mxu2 %v711_v0  ;;  %v702_v7 = vld [vmem:[%s2901_s3 + $0x30] sm:$0xff]  ;;  %v708_v9 = vld [vmem:[%s2901_s3 + $0x60] sm:$0xff]  ;;  %s2916_s30 = scalar_lea.vmem %s2902_s4, %s2499_s23  ;;  %s2416_s24 = smov 96   ;;  %vm832_vm10 = vcmask 130048  }
  0x2a   : > { %v526_v40 = vmul.f32 %v2313_v19, %v525_v33  ;;  %v1909_v60 = vor.u32 %v2217_v56, %v1906_v57  ;;  %v701_v10 = vld [vmem:[%s2901_s3 + $0x28] sm:$0xff]  ;;  %v707_v13 = vld [vmem:[%s2901_s3 + $0x58] sm:$0xff]  ;;  %v700_v14 = vld [vmem:[%s2901_s3 + $0x20] sm:$0xff]  ;;  %s2418_s25 = smov 32   ;;  %p2208_p5 = scmp.ne.s32.totalorder %s2493_s22, 1 }
  0x2b   : > { %715 = vmatpush.msra.mxu2 %v710_v1  ;;  %v706_v16 = vld [vmem:[%s2901_s3 + $0x50] sm:$0xff]  ;;  %v699_v17 = vld [vmem:[%s2901_s3 + $0x18] sm:$0xff]  ;;  %v704_v22 = vld [vmem:[%s2901_s3 + $0x40] sm:$0xff] }
  0x2c   : > { %667 = vmatpush.bf16.msra.mxu0 %v1937_v30  ;;  %v527_v47 = vadd.f32 %v2313_v19, %v526_v40  ;;  %v698_v20 = vld [vmem:[%s2901_s3 + $0x10] sm:$0xff]  ;;  %v2310_v33 = vld [vmem:[%s2916_s30] ss:$0 sm:$0xff]  ;;  %s2417_s30 = smov 64  }
  0x2d   : > { %521 = vadd.xlane.f32.xlu0 %v518_v5  ;;  %681 = vmatpush.bf16.msra.mxu1 %v1941_v32  ;;  %v703_v5 = vld [vmem:[%s2901_s3 + $0x38] sm:$0xff]  ;;  %v696_v40 = vld [vmem:[%s2901_s3] sm:$0xff] }
  0x2e   : > { %v2585_v58 = vsel %vm528_vm0, %v2313_v19, %v527_v47  ;;  %758 = vmatpush.msra.mxu3 %v703_v5  ;;  %716 = vmatpush.msra.mxu2 %v709_v3  ;;  %v705_v19 = vld [vmem:[%s2901_s3 + $0x48] sm:$0xff]  ;;  %v578_v41 = vld [vmem:[%s2515_s16] sm:$0x3] }
  0x2f   : > { %v580_v42 = vperm.slane %v578_v41, 0  ;;  %v581_v43 = vperm.slane %v578_v41, 1  ;;  %v694_v53 = vld [vmem:[%s2900_s2] sm:$0xff] }
  0x30   : > { %668 = vmatpush.bf16.msra.mxu0 %v1929_v37  ;;  %759 = vmatpush.msra.mxu3 %v702_v7  ;;  %v692_v56 = vld [vmem:[%s2899_s1] sm:$0xff] }
  0x31   : > { %682 = vmatpush.bf16.msra.mxu1 %v1933_v39  ;;  %717 = vmatpush.msra.mxu2 %v708_v9  ;;  %v697_v39 = vld [vmem:[%s2901_s3 + $0x8] sm:$0xff] }
  0x32   : > { %760 = vmatpush.msra.mxu3 %v701_v10 }
  0x33   : > { %718 = vmatpush.msra.mxu2 %v707_v13 }
  0x34   : > { %669 = vmatpush.bf16.msra.mxu0 %v1921_v44  ;;  %761 = vmatpush.msra.mxu3 %v700_v14 }
  0x35   : > { %683 = vmatpush.bf16.msra.mxu1 %v1925_v46  ;;  %719 = vmatpush.msra.mxu2 %v706_v16 }
  0x36   : > { %762 = vmatpush.msra.mxu3 %v699_v17 }
  0x37   : > { %720 = vmatpush.msra.mxu2 %v705_v19 }
  0x38   : > { %670 = vmatpush.bf16.msra.mxu0 %v1913_v51  ;;  %763 = vmatpush.msra.mxu3 %v698_v20 }
  0x39   : > { %684 = vmatpush.bf16.msra.mxu1 %v1917_v55  ;;  %721 = vmatpush.msra.mxu2 %v704_v22 }
  0x3a   : > { %764 = vmatpush.msra.mxu3 %v697_v39 }
  0x3b   : > { %722 = vmatpush.msra.mxu2 %v703_v5 }
  0x3c   : > { %671 = vmatpush.bf16.msra.mxu0 %v1905_v59  ;;  %765 = vmatpush.msra.mxu3 %v696_v40 }
  0x3d   : > { %685 = vmatpush.bf16.msra.mxu1 %v1909_v60  ;;  %723 = vmatpush.msra.mxu2 %v702_v7  ;;  %v693_v60 = vld [vmem:[%s2899_s1 + $0x8] sm:$0xff] }
  0x3f   : > { %724 = vmatpush.msra.mxu2 %v701_v10 }
  0x41   : > { %725 = vmatpush.msra.mxu2 %v700_v14 }
  0x43   : > { %726 = vmatpush.msra.mxu2 %v699_v17 }
  0x45   : > { %727 = vmatpush.msra.mxu2 %v698_v20  ;;  %v777_v20 = vlaneseq }
  0x47   : > { %728 = vmatpush.msra.mxu2 %v697_v39  ;;  %v2668_v22 = vand.u32 127, %v777_v20 }
  0x49   : > { %729 = vmatpush.msra.mxu2 %v696_v40 }
  0x98   : > { %v520_v61 = vpop.xlane.xlu0 %519 }
  0x99   : > { %v530_v62 = vmul.f32 %v2585_v58, %v520_v61  ;;  %v695_v61 = vld [vmem:[%s2900_s2 + $0x8] sm:$0xff] }
  0x9b   : > { %v532_v63 = vadd.f32 1e-06, %v530_v62 }
  0x9d   : > { %2314 = vrsqrt.f32 %v532_v63  ;;  %vm540_vm2 = vweird.f32 %v532_v63 }
  0xa0   : > { %v522_v6 = vpop.xlane.xlu0 %521 }
  0xa1   : > { %v531_v8 = vmul.f32 %v2585_v58, %v522_v6 }
  0xa3   : > { %v2315_v11 = vpop.eup %2314  ;;  %v533_v12 = vadd.f32 1e-06, %v531_v8 }
  0xa4   : > { %v535_v15 = vmul.f32 %v2315_v11, %v532_v63  ;;  %vm541_vm1 = vweird.f32 %v2315_v11 }
  0xa5   : > { %2316 = vrsqrt.f32 %v533_v12  ;;  %vm542_vm3 = vmor %vm540_vm2, %vm541_vm1  ;;  %vm550_vm5 = vweird.f32 %v533_v12 }
  0xa6   : > { %v536_v18 = vmul.f32 %v2315_v11, %v535_v15 }
  0xa8   : > { %v537_v21 = vmul.f32 0.5, %v536_v18 }
  0xaa   : > { %v538_v23 = vsub.f32 1.5, %v537_v21  ;;  %v2666_v21 = vshrl.u32 %v777_v20, 7 }
  0xab   : > { %v2317_v24 = vpop.eup %2316 }
  0xac   : > { %v545_v25 = vmul.f32 %v2317_v24, %v533_v12  ;;  %v539_v26 = vmul.f32 %v2315_v11, %v538_v23  ;;  %vm551_vm4 = vweird.f32 %v2317_v24  ;;  %vm782_vm9 = vcmp.le.s32.totalorder %v2668_v22, %v2666_v21 }
  0xad   : > { %vm552_vm6 = vmor %vm550_vm5, %vm551_vm4 }
  0xae   : > { %v546_v27 = vmul.f32 %v2317_v24, %v545_v25  ;;  %v543_v30 = vsel %vm542_vm3, %v2315_v11, %v539_v26  ;;  %v2677_v26 = vadd.s32 8, %v2666_v21 }
  0xaf   : > { %v554_v32 = vmul.f32 %v543_v30, %v2545_v2 }
  0xb0   : > { %v547_v28 = vmul.f32 0.5, %v546_v27  ;;  %vm783_vm11 = vcmp.le.s32.totalorder %v2668_v22, %v2677_v26 }
  0xb1   : > { %v559_v36 = vmul.f32 %v2310_v33, %v554_v32 }
  0xb2   : > { %v548_v29 = vsub.f32 1.5, %v547_v28 }
  0xb4   : > { %v549_v31 = vmul.f32 %v2317_v24, %v548_v29 }
  0xb6   : > { %v553_v34 = vsel %vm552_vm6, %v2317_v24, %v549_v31 }
  0xb7   : > { %v555_v35 = vmul.f32 %v553_v34, %v2549_v4 }
  0xb9   : > { %v560_v37 = vmul.f32 %v2310_v33, %v555_v35 }
  0xbb   : > { %v561_v38 = vpack.c.bf16 %v560_v37, %v559_v36 }
  0xbd   : > { %672 = vmatmul.bf16.vlgmr.msra.gmra.mxu0 %v561_v38  ;;  %686 = vmatmul.bf16.vlgmr.msra.gmra.mxu1 %v561_v38 }
 0x13a   : > { %v673_v44 = vpop.f32.mrf.mxu0  ;;  %v687_v45 = vpop.f32.mrf.mxu1 }
 0x13b   : > { %v674_v46 = vadd.f32 %v673_v44, %v580_v42  ;;  %v688_v47 = vadd.f32 %v687_v45, %v581_v43 }
 0x13d   : > { %730 = vmatmul.f32.vlgmr.msra.gmra.mxu2 %v674_v46  ;;  %1966 = vmatmul.msk.f32.vlgmr.msra.gmra.mxu3 %vm743_vm7, %v688_v47  ;;  %v712_v59 = vmul.f32 %v692_v56, %v674_v46  ;;  %v741_v0 = vmul.f32 %v692_v56, %v688_v47 }
 0x142   : > { %v675_v48 = vpop.f32.mrf.mxu0  ;;  %v689_v49 = vpop.f32.mrf.mxu1 }
 0x143   : > { %v676_v50 = vadd.f32 %v675_v48, %v580_v42  ;;  %v690_v51 = vadd.f32 %v689_v49, %v581_v43 }
 0x145   : > { %733 = vmatmul.f32.gmra.mxu2 %v676_v50  ;;  %1967 = vmatmul.msk.f32.gmra.mxu3 %vm743_vm7, %v690_v51  ;;  %v2645_v52 = vpack.c.bf16 %v690_v51, %v688_v47  ;;  %v713_v5 = vmul.f32 %v693_v60, %v676_v50  ;;  %v742_v7 = vmul.f32 %v693_v60, %v690_v51 }
 0x1c0   : > { %v731_v54 = vpop.f32.mrf.mxu2  ;;  %v767_v55 = vpop.f32.mrf.mxu3 }
 0x1c1   : > { %v737_v57 = vmul.f32 %v731_v54, %v694_v53  ;;  %v773_v63 = vmul.f32 %v767_v55, %v694_v53 }
 0x1c3   : > { %v739_v62 = vadd.f32 %v737_v57, %v712_v59  ;;  %v775_v10 = vadd.f32 %v773_v63, %v741_v0  ;;  %v2236_v57 = vld [vmem:[%s2521_s20 + $0x18] sm:$0xff] }
 0x1c4   : > { %992 = vmatpush.bf16.msrb.mxu0 %v2236_v57 }
 0x1c5   : > { %v784_v9 = vpack.c.bf16 %v739_v62, %v739_v62 }
 0x1c7   : > { %v806_v15 = vunpack.c.l.b16 %v784_v9  ;;  %v2233_v9 = vld [vmem:[%s2521_s20] sm:$0xff] }
 0x1c8   : > { %v734_v1 = vpop.f32.mrf.mxu2  ;;  %v770_v3 = vpop.f32.mrf.mxu3 }
 0x1c9   : > { %v738_v6 = vmul.f32 %v734_v1, %v695_v61  ;;  %v774_v8 = vmul.f32 %v770_v3, %v695_v61  ;;  %v2235_v61 = vld [vmem:[%s2521_s20 + $0x10] sm:$0xff]  ;;  %v2234_v3 = vld [vmem:[%s2521_s20 + $0x8] sm:$0xff] }
 0x1ca   : > { %993 = vmatpush.bf16.msrb.mxu0 %v2235_v61 }
 0x1cb   : > { %v740_v11 = vadd.f32 %v738_v6, %v713_v5  ;;  %v776_v12 = vadd.f32 %v774_v8, %v742_v7 }
 0x1cd   : > { %v785_v13 = vpack.c.bf16 %v740_v11, %v740_v11  ;;  %v2659_v14 = vpack.c.bf16 %v776_v12, %v775_v10 }
 0x1cf   : > { %v807_v16 = vunpack.c.l.b16 %v785_v13  ;;  %v814_v17 = vsel %vm809_vm8, %v2659_v14, 0 }
 0x1d0   : > { %823 = vmatpush.bf16.xpose.msrb.mxu3 %v814_v17  ;;  %921 = vmatpush.bf16.xpose.msrb.mxu2 %v814_v17 }
 0x1d1   : > { %v808_v18 = vpack.c.b16 %v807_v16, %v806_v15 }
 0x1d3   : > { %909 = vrot.lane.b32.xlu1 %v808_v18, %s2416_s24 }
 0x1d7   : > { %1968 = vmatmul.msk.bf16.vlgmr.msrb.gmra.mxu3 %vm809_vm8, %v808_v18 }
 0x245   : > { %v910_v19 = vpop.permute.xlu1 %909 }
 0x246   : > { %1979 = vmatmul.msk.bf16.vlgmr.msrb.gmra.mxu2 %vm809_vm8, %v910_v19 }
 0x25a   : > { %v825_v23 = vpop.f32.mrf.mxu3 }
 0x25b   : > { %v830_v24 = vsel %vm782_vm9, %v825_v23, -1e+30 }
 0x25c   : > { %v833_v25 = vsel %vm832_vm10, %v830_v24, -inf }
 0x25d   : > { %834 = vmax.xlane.f32.xlu1 %v833_v25 }
 0x262   : > { %v827_v27 = vpop.f32.mrf.mxu3 }
 0x263   : > { %v831_v28 = vsel %vm783_vm11, %v827_v27, -1e+30 }
 0x264   : > { %v836_v29 = vsel %vm832_vm10, %v831_v28, -inf }
 0x265   : > { %837 = vmax.xlane.f32.xlu2 %v836_v29 }
 0x276   : > { %1002 = vrot.lane.b32.xlu1 %v808_v18, %s2417_s30 }
 0x2c9   : > { %v923_v30 = vpop.f32.mrf.mxu2 }
 0x2ca   : > { %v928_v31 = vsel %vm782_vm9, %v923_v30, -1e+30 }
 0x2cb   : > { %v930_v32 = vsel %vm832_vm10, %v928_v31, -inf }
 0x2cc   : > { %931 = vmax.xlane.f32.xlu2 %v930_v32 }
 0x2d0   : > { %v835_v33 = vpop.xlane.xlu1 %834 }
 0x2d1   : > { %v839_v34 = vsub.f32 %v830_v24, %v835_v33  ;;  %v925_v35 = vpop.f32.mrf.mxu2 }
 0x2d2   : > { %v929_v36 = vsel %vm783_vm11, %v925_v35, -1e+30 }
 0x2d3   : > { %v841_v37 = vmul.f32 1.442695, %v839_v34  ;;  %v933_v38 = vsel %vm832_vm10, %v929_v36, -inf }
 0x2d4   : > { %934 = vmax.xlane.f32.xlu0 %v933_v38 }
 0x2d5   : > { %2318 = vpow2.f32 %v841_v37 }
 0x2d8   : > { %v838_v39 = vpop.xlane.xlu2 %837 }
 0x2d9   : > { %v840_v40 = vsub.f32 %v831_v28, %v838_v39 }
 0x2db   : > { %v2319_v41 = vpop.eup %2318  ;;  %v843_v42 = vmul.f32 1.442695, %v840_v40 }
 0x2dc   : > { %v845_v43 = vsel %vm832_vm10, %v2319_v41, 0.0 }
 0x2dd   : > { %2320 = vpow2.f32 %v843_v42  ;;  %846 = vadd.xlane.f32.xlu2 %v845_v43 }
 0x2e3   : > { %v2321_v44 = vpop.eup %2320 }
 0x2e4   : > { %v848_v45 = vsel %vm832_vm10, %v2321_v44, 0.0 }
 0x2e5   : > { %849 = vadd.xlane.f32.xlu0 %v848_v45 }
 0x2e8   : > { %v1003_v25 = vpop.permute.xlu1 %1002 }
 0x33f   : > { %v932_v46 = vpop.xlane.xlu2 %931 }
 0x340   : > { %v936_v47 = vsub.f32 %v928_v31, %v932_v46 }
 0x342   : > { %v938_v48 = vmul.f32 1.442695, %v936_v47 }
 0x344   : > { %2322 = vpow2.f32 %v938_v48 }
 0x347   : > { %v935_v49 = vpop.xlane.xlu0 %934 }
 0x348   : > { %v937_v50 = vsub.f32 %v929_v36, %v935_v49 }
 0x34a   : > { %v2323_v51 = vpop.eup %2322  ;;  %v940_v53 = vmul.f32 1.442695, %v937_v50 }
 0x34b   : > { %v942_v54 = vsel %vm832_vm10, %v2323_v51, 0.0 }
 0x34c   : > { %2324 = vpow2.f32 %v940_v53  ;;  %943 = vadd.xlane.f32.xlu2 %v942_v54 }
 0x350   : > { %v847_v59 = vpop.xlane.xlu2 %846 }
 0x352   : > { %v2325_v55 = vpop.eup %2324 }
 0x353   : > { %v945_v56 = vsel %vm832_vm10, %v2325_v55, 0.0 }
 0x354   : > { %946 = vadd.xlane.f32.xlu0 %v945_v56 }
 0x358   : > { %v850_v60 = vpop.xlane.xlu0 %849 }
 0x359   : > { %2326 = vrcp.f32 %v850_v60 }
 0x35a   : > { %2328 = vrcp.f32 %v847_v59 }
 0x35f   : > { %v2327_v63 = vpop.eup %2326 }
 0x360   : > { %v2329_v0 = vpop.eup %2328  ;;  %v854_v1 = vmul.f32 %v2327_v63, %v2321_v44 }
 0x361   : > { %v853_v5 = vmul.f32 %v2329_v0, %v2319_v41 }
 0x363   : > { %v855_v8 = vpack.c.bf16 %v854_v1, %v853_v5 }
 0x364   : > { %857 = vrot.lane.b32.xlu2 %v2645_v52, %s2417_s30 }
 0x368   : > { %1005 = vrot.lane.b32.xlu0 %v2659_v14, %s2416_s24 }
 0x36c   : > { %1104 = vrot.lane.b32.xlu2 %v808_v18, %s2418_s25 }
 0x3bf   : > { %v944_v62 = vpop.xlane.xlu2 %943 }
 0x3c0   : > { %2330 = vrcp.f32 %v944_v62 }
 0x3c6   : > { %v2331_v10 = vpop.eup %2330 }
 0x3c7   : > { %v947_v6 = vpop.xlane.xlu0 %946  ;;  %v858_v7 = vpop.permute.xlu2 %857  ;;  %v950_v12 = vmul.f32 %v2331_v10, %v2323_v51 }
 0x3c8   : > { %2332 = vrcp.f32 %v947_v6  ;;  %870 = vmatpush.bf16.msrb.mxu1 %v858_v7  ;;  %963 = vmatpush.bf16.msra.mxu3 %v858_v7 }
 0x3cb   : > { %1969 = vmatmul.msk.bf16.vlgmr.msrb.gmra.mxu1 %vm832_vm10, %v855_v8 }
 0x3cc   : > { %899 = vmatpush.bf16.msra.mxu1 %v2234_v3 }
 0x3ce   : > { %v2333_v11 = vpop.eup %2332 }
 0x3cf   : > { %v951_v13 = vmul.f32 %v2333_v11, %v2325_v55  ;;  %v1105_v27 = vpop.permute.xlu2 %1104 }
 0x3d0   : > { %900 = vmatpush.bf16.msra.mxu1 %v2233_v9 }
 0x3d1   : > { %v952_v14 = vpack.c.bf16 %v951_v13, %v950_v12 }
 0x3d3   : > { %1980 = vmatmul.msk.bf16.vlgmr.msra.gmra.mxu3 %vm832_vm10, %v952_v14 }
 0x3da   : > { %v1006_v15 = vpop.permute.xlu0 %1005 }
 0x3db   : > { %v1011_v16 = vsel %vm809_vm8, %v1006_v15, 0 }
 0x3dc   : > { %1020 = vmatpush.bf16.xpose.msrb.mxu1 %v1011_v16  ;;  %1116 = vmatpush.bf16.xpose.msra.mxu0 %v1011_v16 }
 0x448   : > { %v872_v17 = vpop.f32.mrf.mxu1 }
 0x450   : > { %v874_v18 = vpop.f32.mrf.mxu1 }
 0x451   : > { %v877_v19 = vpack.c.bf16 %v874_v18, %v872_v17  ;;  %v2240_v17 = vld [vmem:[%s2521_s20 + $0x38] sm:$0xff]  ;;  %v2238_v18 = vld [vmem:[%s2521_s20 + $0x28] sm:$0xff] }
 0x452   : > { %1094 = vmatpush.bf16.msrb.mxu3 %v2238_v18 }
 0x453   : > { %1978 = vmatmul.msk.bf16.vlgmr.msra.gmra.mxu1 %vm809_vm8, %v877_v19  ;;  %v2239_v19 = vld [vmem:[%s2521_s20 + $0x30] sm:$0xff] }
 0x456   : > { %v965_v20 = vpop.f32.mrf.mxu3 }
 0x45e   : > { %v967_v23 = vpop.f32.mrf.mxu3 }
 0x45f   : > { %v970_v24 = vpack.c.bf16 %v967_v23, %v965_v20  ;;  %v2237_v20 = vld [vmem:[%s2521_s20 + $0x20] sm:$0xff] }
 0x460   : > { %1095 = vmatpush.bf16.msrb.mxu3 %v2237_v20  ;;  %v2088_v20 = vld [vmem:[%s2536_s13 + $0x98] sm:$0xf0] }
 0x461   : > { %1989 = vmatmul.msk.bf16.vlgmr.msrb.gmra.mxu0 %vm809_vm8, %v970_v24 }
 0x463   : > { %1990 = vmatmul.msk.bf16.vlgmr.msrb.gmra.mxu1 %vm809_vm8, %v1003_v25 }
 0x471   : > { %2001 = vmatmul.msk.bf16.vlgmr.msra.gmra.mxu0 %vm809_vm8, %v1105_v27 }
 0x4d0   : > { %v902_v28 = vpop.f32.mrf.mxu1 }
 0x4d1   : > { %v907_v30 = vadd.f32 %v902_v28, %v2545_v2 }
 0x4d8   : > { %v904_v29 = vpop.f32.mrf.mxu1 }
 0x4d9   : > { %v908_v36 = vadd.f32 %v904_v29, %v2549_v4 }
 0x4de   : > { %v995_v31 = vpop.f32.mrf.mxu0 }
 0x4df   : > { %v2715_v32 = vadd.f32 %v995_v31, %v907_v30 }
 0x4e0   : > { %v1022_v33 = vpop.f32.mrf.mxu1 }
 0x4e1   : > { %v1027_v34 = vsel %vm782_vm9, %v1022_v33, -1e+30 }
 0x4e2   : > { %v1029_v35 = vsel %vm832_vm10, %v1027_v34, -inf }
 0x4e3   : > { %1030 = vmax.xlane.f32.xlu0 %v1029_v35 }
 0x4e6   : > { %v997_v37 = vpop.f32.mrf.mxu0 }
 0x4e7   : > { %v2722_v38 = vadd.f32 %v997_v37, %v908_v36 }
 0x4e8   : > { %v1024_v39 = vpop.f32.mrf.mxu1 }
 0x4e9   : > { %v1028_v2 = vsel %vm783_vm11, %v1024_v39, -1e+30 }
 0x4ea   : > { %v1032_v40 = vsel %vm832_vm10, %v1028_v2, -inf }
 0x4eb   : > { %1033 = vmax.xlane.f32.xlu2 %v1032_v40 }
 0x4ee   : > { %v1118_v41 = vpop.f32.mrf.mxu0 }
 0x4ef   : > { %v1123_v42 = vsel %vm782_vm9, %v1118_v41, -1e+30  ;;  %v2271_v41 = vld [vmem:[%s2536_s13 + $0xec] sm:$0xf0] }
 0x4f0   : > { %v1125_v43 = vsel %vm832_vm10, %v1123_v42, -inf }
 0x4f1   : > { %1126 = vmax.xlane.f32.xlu1 %v1125_v43 }
 0x4f6   : > { %v1120_v4 = vpop.f32.mrf.mxu0 }
 0x4f7   : > { %v1124_v44 = vsel %vm783_vm11, %v1120_v4, -1e+30  ;;  %v2128_v4 = vld [vmem:[%s2536_s13 + $0xf0] sm:$0xf0] }
 0x4f8   : > { %v1128_v45 = vsel %vm832_vm10, %v1124_v44, -inf }
 0x4f9   : > { %1129 = vmax.xlane.f32.xlu0 %v1128_v45  ;;  %v2272_v45 = vld [vmem:[%s2536_s13 + $0xf4] sm:$0xf0] }
 0x556   : > { %v1031_v46 = vpop.xlane.xlu0 %1030 }
 0x557   : > { %v1035_v47 = vsub.f32 %v1027_v34, %v1031_v46 }
 0x559   : > { %v1037_v48 = vmul.f32 1.442695, %v1035_v47  ;;  %v2270_v47 = vld [vmem:[%s2536_s13 + $0xec] sm:$0xf] }
 0x55b   : > { %2334 = vpow2.f32 %v1037_v48  ;;  %v2136_v48 = vld [vmem:[%s2536_s13 + $0xf8] sm:$0xf0] }
 0x55e   : > { %v1034_v49 = vpop.xlane.xlu2 %1033 }
 0x55f   : > { %v1036_v50 = vsub.f32 %v1028_v2, %v1034_v49  ;;  %v2139_v49 = vor.u32 %v2270_v47, %v2136_v48  ;;  %v2056_v47 = vld [vmem:[%s2536_s13 + $0x58] sm:$0xf0] }
 0x561   : > { %v2335_v51 = vpop.eup %2334  ;;  %v1039_v21 = vmul.f32 1.442695, %v1036_v50  ;;  %v2110_v50 = vld [vmem:[%s2536_s13 + $0xc0] sm:$0xf] }
 0x562   : > { %v1041_v53 = vsel %vm832_vm10, %v2335_v51, 0.0 }
 0x563   : > { %2336 = vpow2.f32 %v1039_v21  ;;  %1042 = vadd.xlane.f32.xlu2 %v1041_v53  ;;  %v2265_v21 = vld [vmem:[%s2536_s13 + $0xc4] sm:$0xf] }
 0x564   : > { %v1127_v54 = vpop.xlane.xlu1 %1126 }
 0x565   : > { %v1131_v55 = vsub.f32 %v1123_v42, %v1127_v54  ;;  %v2269_v42 = vld [vmem:[%s2536_s13 + $0xe4] sm:$0xf]  ;;  %v2112_v54 = vld [vmem:[%s2536_s13 + $0xd0] sm:$0xf0] }
 0x567   : > { %v1133_v56 = vmul.f32 1.442695, %v1131_v55  ;;  %v2118_v55 = vld [vmem:[%s2536_s13 + $0xc8] sm:$0xf] }
 0x569   : > { %v2337_v22 = vpop.eup %2336  ;;  %2338 = vpow2.f32 %v1133_v56  ;;  %v2268_v56 = vld [vmem:[%s2536_s13 + $0xd4] sm:$0xf0] }
 0x56a   : > { %v1044_v26 = vsel %vm832_vm10, %v2337_v22, 0.0 }
 0x56b   : > { %1045 = vadd.xlane.f32.xlu0 %v1044_v26  ;;  %v2119_v26 = vor.u32 %v2268_v56, %v2118_v55  ;;  %v2248_v55 = vld [vmem:[%s2536_s13 + $0x34] sm:$0xf0] }
 0x56c   : > { %v1130_v57 = vpop.xlane.xlu0 %1129 }
 0x56d   : > { %v1132_v59 = vsub.f32 %v1124_v44, %v1130_v57  ;;  %v2134_v44 = vld [vmem:[%s2536_s13 + $0xe8] sm:$0xf]  ;;  %v2266_v57 = vld [vmem:[%s2536_s13 + $0xcc] sm:$0xf] }
 0x56e   : > { %v2135_v46 = vor.u32 %v2272_v45, %v2134_v44  ;;  %v2252_v44 = vld [vmem:[%s2536_s13 + $0x54] sm:$0xf0] }
 0x56f   : > { %v2339_v60 = vpop.eup %2338  ;;  %v1135_v61 = vmul.f32 1.442695, %v1132_v59  ;;  %v2120_v59 = vld [vmem:[%s2536_s13 + $0xd8] sm:$0xf0] }
 0x570   : > { %v1137_v62 = vsel %vm832_vm10, %v2339_v60, 0.0 }
 0x571   : > { %2340 = vpow2.f32 %v1135_v61  ;;  %1138 = vadd.xlane.f32.xlu2 %v1137_v62  ;;  %v2094_v61 = vld [vmem:[%s2536_s13 + $0xa0] sm:$0xf]  ;;  %v2263_v62 = vld [vmem:[%s2536_s13 + $0xac] sm:$0xf0] }
 0x577   : > { %v2341_v63 = vpop.eup %2340 }
 0x578   : > { %v1140_v0 = vsel %vm832_vm10, %v2341_v63, 0.0 }
 0x579   : > { %1141 = vadd.xlane.f32.xlu1 %v1140_v0  ;;  %v2095_v0 = vor.u32 %v2263_v62, %v2094_v61  ;;  %v2243_v61 = vld [vmem:[%s2536_s13 + $0xc] sm:$0xf0]  ;;  %v2241_v62 = vld [vmem:[%s2536_s13 + $0x4] sm:$0xf] }
 0x57f   : > { %1052 = vrot.lane.b32.xlu0 %v2645_v52, %s2418_s25 }
 0x5d6   : > { %v1043_v1 = vpop.xlane.xlu2 %1042 }
 0x5de   : > { %v1046_v3 = vpop.xlane.xlu0 %1045 }
 0x5df   : > { %2342 = vrcp.f32 %v1046_v3  ;;  %v2102_v3 = vld [vmem:[%s2536_s13 + $0xa8] sm:$0xf] }
 0x5e0   : > { %2344 = vrcp.f32 %v1043_v1  ;;  %v2096_v1 = vld [vmem:[%s2536_s13 + $0xb0] sm:$0xf0] }
 0x5e4   : > { %v1139_v5 = vpop.xlane.xlu2 %1138 }
 0x5e5   : > { %2346 = vrcp.f32 %v1139_v5  ;;  %v2343_v6 = vpop.eup %2342  ;;  %v2264_v5 = vld [vmem:[%s2536_s13 + $0xb4] sm:$0xf0] }
 0x5e6   : > { %v2345_v8 = vpop.eup %2344  ;;  %v1050_v9 = vmul.f32 %v2343_v6, %v2337_v22  ;;  %v2115_v22 = vor.u32 %v2265_v21, %v2112_v54  ;;  %v2038_v54 = vld [vmem:[%s2536_s13 + $0x28] sm:$0xf] }
 0x5e7   : > { %v1049_v11 = vmul.f32 %v2345_v8, %v2335_v51  ;;  %v2267_v51 = vld [vmem:[%s2536_s13 + $0xcc] sm:$0xf0]  ;;  %v2262_v8 = vld [vmem:[%s2536_s13 + $0xac] sm:$0xf] }
 0x5e8   : > { %v2111_v53 = vor.u32 %v2267_v51, %v2110_v50  ;;  %v2247_v50 = vld [vmem:[%s2536_s13 + $0x2c] sm:$0xf0]  ;;  %v2245_v51 = vld [vmem:[%s2536_s13 + $0x24] sm:$0xf] }
 0x5e9   : > { %v1051_v13 = vpack.c.bf16 %v1050_v9, %v1049_v11  ;;  %v2104_v9 = vld [vmem:[%s2536_s13 + $0xb8] sm:$0xf0]  ;;  %v2078_v11 = vld [vmem:[%s2536_s13 + $0x80] sm:$0xf] }
 0x5eb   : > { %v2347_v10 = vpop.eup %2346 }
 0x5ec   : > { %v1142_v7 = vpop.xlane.xlu1 %1141  ;;  %v1145_v14 = vmul.f32 %v2347_v10, %v2339_v60  ;;  %v2123_v60 = vor.u32 %v2266_v57, %v2120_v59  ;;  %v2107_v10 = vor.u32 %v2262_v8, %v2104_v9  ;;  %v2040_v57 = vld [vmem:[%s2536_s13 + $0x38] sm:$0xf0]  ;;  %v2242_v9 = vld [vmem:[%s2536_s13 + $0xc] sm:$0xf] }
 0x5ed   : > { %2348 = vrcp.f32 %v1142_v7  ;;  %v2103_v7 = vor.u32 %v2264_v5, %v2102_v3  ;;  %v2022_v3 = vld [vmem:[%s2536_s13 + $0x8] sm:$0xf]  ;;  %v2244_v5 = vld [vmem:[%s2536_s13 + $0x14] sm:$0xf0] }
 0x5ee   : > { %v2023_v8 = vor.u32 %v2244_v5, %v2022_v3 }
 0x5f1   : > { %v1053_v12 = vpop.permute.xlu0 %1052 }
 0x5f2   : > { %1065 = vmatpush.bf16.msra.mxu2 %v1053_v12  ;;  %1158 = vmatpush.bf16.msra.mxu1 %v1053_v12  ;;  %v2259_v12 = vld [vmem:[%s2536_s13 + $0x8c] sm:$0xf0] }
 0x5f3   : > { %v2349_v52 = vpop.eup %2348 }
 0x5f4   : > { %v1146_v15 = vmul.f32 %v2349_v52, %v2341_v63  ;;  %v2261_v63 = vld [vmem:[%s2536_s13 + $0xa4] sm:$0xf] }
 0x5f5   : > { %1991 = vmatmul.msk.bf16.vlgmr.msra.gmra.mxu2 %vm832_vm10, %v1051_v13  ;;  %v2099_v6 = vor.u32 %v2261_v63, %v2096_v1  ;;  %v2257_v52 = vld [vmem:[%s2536_s13 + $0x84] sm:$0xf]  ;;  %v2079_v13 = vor.u32 %v2259_v12, %v2078_v11  ;;  %v2016_v1 = vld [vmem:[%s2536_s13 + $0x10] sm:$0xf0] }
 0x5f6   : > { %v1147_v16 = vpack.c.bf16 %v1146_v15, %v1145_v14  ;;  %1187 = vmatpush.bf16.msrb.mxu2 %v2240_v17  ;;  %1456 = vmatpush.bf16.msrb.mxu1 %v2135_v46  ;;  %v2080_v14 = vld [vmem:[%s2536_s13 + $0x90] sm:$0xf0]  ;;  %v2086_v15 = vld [vmem:[%s2536_s13 + $0x88] sm:$0xf]  ;;  %v2250_v46 = vld [vmem:[%s2536_s13 + $0x4c] sm:$0xf] }
 0x5f7   : > { %v2083_v17 = vor.u32 %v2257_v52, %v2080_v14  ;;  %v2059_v48 = vor.u32 %v2250_v46, %v2056_v47  ;;  %v2277_v46 = vld [vmem:[%s2531_s5 + $0x20] sm:$0xff] }
 0x5f8   : > { %2002 = vmatmul.msk.bf16.vlgmr.msra.gmra.mxu1 %vm832_vm10, %v1147_v16  ;;  %v2260_v16 = vld [vmem:[%s2536_s13 + $0x94] sm:$0xf0] }
 0x5f9   : > { %v2087_v18 = vor.u32 %v2260_v16, %v2086_v15 }
 0x5fa   : > { %1188 = vmatpush.bf16.msrb.mxu2 %v2239_v19  ;;  %1457 = vmatpush.bf16.msrb.mxu1 %v2119_v26  ;;  %v2258_v19 = vld [vmem:[%s2536_s13 + $0x8c] sm:$0xf] }
 0x5fb   : > { %v2246_v26 = vld [vmem:[%s2536_s13 + $0x2c] sm:$0xf] }
 0x5fc   : > { %v2043_v59 = vor.u32 %v2246_v26, %v2040_v57 }
 0x5fe   : > { %1470 = vmatpush.bf16.msra.mxu2 %v2139_v49  ;;  %1458 = vmatpush.bf16.msrb.mxu1 %v2103_v7  ;;  %v2030_v49 = vld [vmem:[%s2536_s13 + $0x20] sm:$0xf]  ;;  %v2019_v7 = vor.u32 %v2241_v62, %v2016_v1 }
 0x5ff   : > { %v2031_v21 = vor.u32 %v2247_v50, %v2030_v49  ;;  %v2276_v50 = vld [vmem:[%s2531_s5 + $0x18] sm:$0xff] }
 0x602   : > { %1471 = vmatpush.bf16.msra.mxu2 %v2123_v60  ;;  %1459 = vmatpush.bf16.msrb.mxu1 %v2087_v18  ;;  %v2014_v60 = vld [vmem:[%s2536_s13] sm:$0xf] }
 0x606   : > { %1472 = vmatpush.bf16.msra.mxu2 %v2107_v10  ;;  %v2024_v10 = vld [vmem:[%s2536_s13 + $0x18] sm:$0xf0] }
 0x607   : > { %v2027_v11 = vor.u32 %v2242_v9, %v2024_v10 }
 0x675   : > { %v1160_v23 = vpop.f32.mrf.mxu1 }
 0x678   : > { %v1067_v24 = vpop.f32.mrf.mxu2 }
 0x67d   : > { %v1162_v25 = vpop.f32.mrf.mxu1 }
 0x67e   : > { %v1165_v27 = vpack.c.bf16 %v1162_v25, %v1160_v23  ;;  %v2091_v23 = vor.u32 %v2258_v19, %v2088_v20  ;;  %v2255_v25 = vld [vmem:[%s2536_s13 + $0x6c] sm:$0xf0] }
 0x680   : > { %v1069_v28 = vpop.f32.mrf.mxu2  ;;  %2011 = vmatmul.msk.bf16.vlgmr.msrb.gmra.mxu2 %vm809_vm8, %v1165_v27  ;;  %v2253_v27 = vld [vmem:[%s2536_s13 + $0x64] sm:$0xf] }
 0x681   : > { %v1072_v29 = vpack.c.bf16 %v1069_v28, %v1067_v24  ;;  %v2062_v24 = vld [vmem:[%s2536_s13 + $0x60] sm:$0xf]  ;;  %1473 = vmatpush.bf16.msra.mxu2 %v2091_v23 }
 0x682   : > { %v2063_v28 = vor.u32 %v2255_v25, %v2062_v24 }
 0x683   : > { %2000 = vmatmul.msk.bf16.vlgmr.msrb.gmra.mxu3 %vm809_vm8, %v1072_v29  ;;  %v2064_v29 = vld [vmem:[%s2536_s13 + $0x70] sm:$0xf0] }
 0x703   : > { %v1190_v30 = vpop.f32.mrf.mxu2 }
 0x706   : > { %v1097_v31 = vpop.f32.mrf.mxu3 }
 0x707   : > { %v1102_v33 = vadd.f32 %v1097_v31, %v2715_v32  ;;  %v2126_v32 = vld [vmem:[%s2536_s13 + $0xe0] sm:$0xf]  ;;  %v2256_v31 = vld [vmem:[%s2536_s13 + $0x74] sm:$0xf0] }
 0x708   : > { %v2127_v43 = vor.u32 %v2271_v41, %v2126_v32  ;;  %v2251_v32 = vld [vmem:[%s2536_s13 + $0x4c] sm:$0xf0]  ;;  %v2249_v41 = vld [vmem:[%s2536_s13 + $0x44] sm:$0xf] }
 0x709   : > { %v2751_v34 = vadd.f32 %v1190_v30, %v1102_v33  ;;  %v2070_v30 = vld [vmem:[%s2536_s13 + $0x68] sm:$0xf]  ;;  %v2067_v33 = vor.u32 %v2253_v27, %v2064_v29 }
 0x70a   : > { %1428 = vmatpush.bf16.msra.mxu3 %v2127_v43  ;;  %v2048_v43 = vld [vmem:[%s2536_s13 + $0x50] sm:$0xf0] }
 0x70b   : > { %v1198_v35 = vmul.f32 %v2751_v34, %v2751_v34  ;;  %v1192_v39 = vpop.f32.mrf.mxu2  ;;  %v2051_v45 = vor.u32 %v2249_v41, %v2048_v43  ;;  %v2287_v41 = vld [vmem:[%s2531_s5 + $0x70] sm:$0xff]  ;;  %v2286_v43 = vld [vmem:[%s2531_s5 + $0x68] sm:$0xff] }
 0x70d   : > { %1200 = vadd.xlane.f32.xlu2 %v1198_v35  ;;  %v2071_v35 = vor.u32 %v2256_v31, %v2070_v30 }
 0x70e   : > { %v1099_v36 = vpop.f32.mrf.mxu3  ;;  %1429 = vmatpush.bf16.msra.mxu3 %v2111_v53  ;;  %v2032_v53 = vld [vmem:[%s2536_s13 + $0x30] sm:$0xf0] }
 0x70f   : > { %v1103_v37 = vadd.f32 %v1099_v36, %v2722_v38  ;;  %v2131_v38 = vor.u32 %v2269_v42, %v2128_v4  ;;  %v2254_v36 = vld [vmem:[%s2536_s13 + $0x6c] sm:$0xf]  ;;  %1460 = vmatpush.bf16.msrb.mxu1 %v2071_v35  ;;  %v2054_v4 = vld [vmem:[%s2536_s13 + $0x48] sm:$0xf]  ;;  %v2035_v56 = vor.u32 %v2245_v51, %v2032_v53  ;;  %v2275_v53 = vld [vmem:[%s2531_s5 + $0x10] sm:$0xff] }
 0x710   : > { %v2282_v51 = vld [vmem:[%s2531_s5 + $0x48] sm:$0xff] }
 0x711   : > { %v2756_v2 = vadd.f32 %v1192_v39, %v1103_v37  ;;  %1442 = vmatpush.bf16.msrb.mxu0 %v2131_v38  ;;  %v2072_v37 = vld [vmem:[%s2536_s13 + $0x78] sm:$0xf0]  ;;  %v2055_v38 = vor.u32 %v2252_v44, %v2054_v4  ;;  %v2279_v4 = vld [vmem:[%s2531_s5 + $0x30] sm:$0xff]  ;;  %v2285_v44 = vld [vmem:[%s2531_s5 + $0x60] sm:$0xff] }
 0x712   : > { %1430 = vmatpush.bf16.msra.mxu3 %v2095_v0  ;;  %v2075_v39 = vor.u32 %v2254_v36, %v2072_v37  ;;  %v2015_v0 = vor.u32 %v2243_v61, %v2014_v60  ;;  %v2273_v61 = vld [vmem:[%s2531_s5] sm:$0xff] }
 0x713   : > { %v1199_v40 = vmul.f32 %v2756_v2, %v2756_v2  ;;  %1461 = vmatpush.bf16.msrb.mxu1 %v2055_v38  ;;  %v2284_v38 = vld [vmem:[%s2531_s5 + $0x58] sm:$0xff] }
 0x714   : > { %1474 = vmatpush.bf16.msra.mxu2 %v2075_v39 }
 0x715   : > { %1202 = vadd.xlane.f32.xlu1 %v1199_v40  ;;  %1443 = vmatpush.bf16.msrb.mxu0 %v2115_v22  ;;  %v2046_v40 = vld [vmem:[%s2536_s13 + $0x40] sm:$0xf]  ;;  %v2039_v22 = vor.u32 %v2248_v55, %v2038_v54 }
 0x716   : > { %1431 = vmatpush.bf16.msra.mxu3 %v2079_v13  ;;  %v2047_v42 = vor.u32 %v2251_v32, %v2046_v40  ;;  %v2288_v32 = vld [vmem:[%s2531_s5 + $0x78] sm:$0xff] }
 0x717   : > { %1462 = vmatpush.bf16.msrb.mxu1 %v2039_v22 }
 0x718   : > { %1475 = vmatpush.bf16.msra.mxu2 %v2059_v48  ;;  %v2283_v48 = vld [vmem:[%s2531_s5 + $0x50] sm:$0xff] }
 0x719   : > { %1444 = vmatpush.bf16.msrb.mxu0 %v2099_v6 }
 0x71a   : > { %1432 = vmatpush.bf16.msra.mxu3 %v2063_v28 }
 0x71b   : > { %1463 = vmatpush.bf16.msrb.mxu1 %v2023_v8 }
 0x71c   : > { %1476 = vmatpush.bf16.msra.mxu2 %v2043_v59  ;;  %v2274_v59 = vld [vmem:[%s2531_s5 + $0x8] sm:$0xff] }
 0x71d   : > { %1445 = vmatpush.bf16.msrb.mxu0 %v2083_v17 }
 0x71e   : > { %1433 = vmatpush.bf16.msra.mxu3 %v2047_v42  ;;  %v2280_v42 = vld [vmem:[%s2531_s5 + $0x38] sm:$0xff] }
 0x720   : > { %1477 = vmatpush.bf16.msra.mxu2 %v2027_v11 }
 0x721   : > { %1446 = vmatpush.bf16.msrb.mxu0 %v2067_v33  ;;  %v2311_v33 = vld [vmem:[%s494_s26] ss:$0 sm:$0xff] }
 0x722   : > { %1434 = vmatpush.bf16.msra.mxu3 %v2031_v21 }
 0x725   : > { %1447 = vmatpush.bf16.msrb.mxu0 %v2051_v45  ;;  %v2278_v45 = vld [vmem:[%s2531_s5 + $0x28] sm:$0xff] }
 0x726   : > { %1435 = vmatpush.bf16.msra.mxu3 %v2015_v0 }
 0x729   : > { %1448 = vmatpush.bf16.msrb.mxu0 %v2035_v56  ;;  %v2281_v56 = vld [vmem:[%s2531_s5 + $0x40] sm:$0xff] }
 0x72a   : > { %1698 = vmatpush.bf16.msrb.mxu3 %v2280_v42 }
 0x72d   : > { %1449 = vmatpush.bf16.msrb.mxu0 %v2019_v7 }
 0x72e   : > { %1699 = vmatpush.bf16.msrb.mxu3 %v2279_v4 }
 0x731   : > { %1712 = vmatpush.bf16.msra.mxu0 %v2288_v32 }
 0x732   : > { %1700 = vmatpush.bf16.msrb.mxu3 %v2278_v45 }
 0x735   : > { %1713 = vmatpush.bf16.msra.mxu0 %v2287_v41 }
 0x736   : > { %1701 = vmatpush.bf16.msrb.mxu3 %v2277_v46 }
 0x739   : > { %1714 = vmatpush.bf16.msra.mxu0 %v2286_v43 }
 0x73a   : > { %1702 = vmatpush.bf16.msrb.mxu3 %v2276_v50 }
 0x73d   : > { %1715 = vmatpush.bf16.msra.mxu0 %v2285_v44 }
 0x73e   : > { %1703 = vmatpush.bf16.msrb.mxu3 %v2275_v53 }
 0x741   : > { %1716 = vmatpush.bf16.msra.mxu0 %v2284_v38 }
 0x742   : > { %1704 = vmatpush.bf16.msrb.mxu3 %v2274_v59 }
 0x745   : > { %1717 = vmatpush.bf16.msra.mxu0 %v2283_v48 }
 0x746   : > { %1705 = vmatpush.bf16.msrb.mxu3 %v2273_v61 }
 0x749   : > { %1718 = vmatpush.bf16.msra.mxu0 %v2282_v51 }
 0x74d   : > { %1719 = vmatpush.bf16.msra.mxu0 %v2281_v56 }
 0x780   : > { %v1201_v63 = vpop.xlane.xlu2 %1200 }
 0x781   : > { %v1204_v6 = vmul.f32 %v1201_v63, %v2585_v58 }
 0x783   : > { %v1206_v12 = vadd.f32 1e-06, %v1204_v6 }
 0x785   : > { %2350 = vrsqrt.f32 %v1206_v12  ;;  %vm1214_vm13 = vweird.f32 %v1206_v12 }
 0x788   : > { %v1203_v52 = vpop.xlane.xlu1 %1202 }
 0x789   : > { %v1205_v13 = vmul.f32 %v1203_v52, %v2585_v58 }
 0x78b   : > { %v2351_v14 = vpop.eup %2350  ;;  %v1207_v15 = vadd.f32 1e-06, %v1205_v13 }
 0x78c   : > { %v1209_v16 = vmul.f32 %v2351_v14, %v1206_v12  ;;  %vm1215_vm12 = vweird.f32 %v2351_v14 }
 0x78d   : > { %2352 = vrsqrt.f32 %v1207_v15  ;;  %vm1216_vm14 = vmor %vm1214_vm13, %vm1215_vm12  ;;  %vm1224_vm0 = vweird.f32 %v1207_v15 }
 0x78e   : > { %v1210_v17 = vmul.f32 %v2351_v14, %v1209_v16 }
 0x790   : > { %v1211_v18 = vmul.f32 0.5, %v1210_v17 }
 0x792   : > { %v1212_v19 = vsub.f32 1.5, %v1211_v18 }
 0x793   : > { %v2353_v20 = vpop.eup %2352 }
 0x794   : > { %v1219_v23 = vmul.f32 %v2353_v20, %v1207_v15  ;;  %v1213_v24 = vmul.f32 %v2351_v14, %v1212_v19  ;;  %vm1225_vm15 = vweird.f32 %v2353_v20 }
 0x795   : > { %vm1226_vm1 = vmor %vm1224_vm0, %vm1225_vm15 }
 0x796   : > { %v1220_v25 = vmul.f32 %v2353_v20, %v1219_v23  ;;  %v1217_v28 = vsel %vm1216_vm14, %v2351_v14, %v1213_v24 }
 0x797   : > { %v1228_v31 = vmul.f32 %v1217_v28, %v2751_v34 }
 0x798   : > { %v1221_v27 = vmul.f32 0.5, %v1220_v25 }
 0x799   : > { %v1233_v37 = vmul.f32 %v2311_v33, %v1228_v31 }
 0x79a   : > { %v1222_v29 = vsub.f32 1.5, %v1221_v27 }
 0x79c   : > { %v1223_v30 = vmul.f32 %v2353_v20, %v1222_v29 }
 0x79e   : > { %v1227_v35 = vsel %vm1226_vm1, %v2353_v20, %v1223_v30 }
 0x79f   : > { %v1229_v36 = vmul.f32 %v1227_v35, %v2756_v2 }
 0x7a1   : > { %v1234_v39 = vmul.f32 %v2311_v33, %v1229_v36 }
 0x7a3   : > { %v1235_v40 = vpack.c.bf16 %v1234_v39, %v1233_v37 }
 0x7a5   : > { %1436 = vmatmul.bf16.vlgmr.msra.gmra.mxu3 %v1235_v40  ;;  %1450 = vmatmul.bf16.vlgmr.msrb.gmra.mxu0 %v1235_v40 }
 0x7a6   : > { %1464 = vmatmul.bf16.vlgmr.msrb.gmra.mxu1 %v1235_v40  ;;  %1478 = vmatmul.bf16.vlgmr.msra.gmra.mxu2 %v1235_v40 }
 0x822   : > { %v2842_v47 = vpop.f32.mrf.mxu0 }
 0x823   : > { %v2141_v49 = vmul.f32 -1.442695, %v2842_v47  ;;  %v1465_v39 = vpop.f32.mrf.mxu1 }
 0x825   : > { %2354 = vpow2.f32 %v2141_v49 }
 0x828   : > { %v2848_v21 = vpop.f32.mrf.mxu3 }
 0x829   : > { %v2140_v54 = vmul.f32 -1.442695, %v2848_v21  ;;  %v1479_v20 = vpop.f32.mrf.mxu2 }
 0x82a   : > { %v2852_v55 = vpop.f32.mrf.mxu0 }
 0x82b   : > { %v2355_v22 = vpop.eup %2354  ;;  %2356 = vpow2.f32 %v2140_v54  ;;  %v2143_v26 = vmul.f32 -1.442695, %v2852_v55 }
 0x82c   : > { %v1497_v57 = vadd.f32 1.0, %v2355_v22 }
 0x82d   : > { %2358 = vpow2.f32 %v2143_v26 }
 0x82e   : > { %2360 = vrcp.f32 %v1497_v57  ;;  %v1526_v13 = vand.u32 2147483648, %v1497_v57  ;;  %vm1520_vm3 = vweird.f32 %v1497_v57  ;;  %v1524_v16 = vand.u32 2147483647, %v1497_v57 }
 0x830   : > { %v2857_v60 = vpop.f32.mrf.mxu3  ;;  %v1527_v24 = vor.u32 1.1754944e-38, %v1526_v13  ;;  %vm1525_vm6 = vcmp.eq.f32.partialorder %v1524_v16, 8.507059e+37 }
 0x831   : > { %v2357_v62 = vpop.eup %2356  ;;  %v2142_v63 = vmul.f32 -1.442695, %v2857_v60  ;;  %v1481_v56 = vpop.f32.mrf.mxu2 }
 0x832   : > { %v1496_v0 = vadd.f32 1.0, %v2357_v62 }
 0x833   : > { %v2359_v1 = vpop.eup %2358  ;;  %2362 = vpow2.f32 %v2142_v63 }
 0x834   : > { %v2361_v3 = vpop.eup %2360  ;;  %2364 = vrcp.f32 %v1496_v0  ;;  %v1499_v6 = vadd.f32 1.0, %v2359_v1  ;;  %v1509_v25 = vand.u32 2147483647, %v1496_v0  ;;  %v1511_v29 = vand.u32 2147483648, %v1496_v0 }
 0x835   : > { %v1516_v5 = vmul.f32 %v2361_v3, %v1497_v57  ;;  %vm1521_vm2 = vweird.f32 %v2361_v3  ;;  %vm1505_vm8 = vweird.f32 %v1496_v0 }
 0x836   : > { %2366 = vrcp.f32 %v1499_v6  ;;  %vm2861_vm4 = vmor %vm1520_vm3, %vm1521_vm2  ;;  %v1556_v30 = vand.u32 2147483648, %v1499_v6  ;;  %v1554_v35 = vand.u32 2147483647, %v1499_v6  ;;  %vm2871_vm10 = vcmp.eq.f32.partialorder %v1509_v25, 8.507059e+37 }
 0x837   : > { %v1517_v7 = vsub.f32 1.0, %v1516_v5  ;;  %vm1550_vm11 = vweird.f32 %v1499_v6  ;;  %v1512_v43 = vor.u32 1.1754944e-38, %v1511_v29 }
 0x838   : > { %v1557_v4 = vor.u32 1.1754944e-38, %v1556_v30  ;;  %vm1555_vm13 = vcmp.eq.f32.partialorder %v1554_v35, 8.507059e+37 }
 0x839   : > { %v2363_v8 = vpop.eup %2362  ;;  %v1518_v9 = vmul.f32 %v2361_v3, %v1517_v7 }
 0x83a   : > { %v2365_v10 = vpop.eup %2364  ;;  %v1498_v11 = vadd.f32 1.0, %v2363_v8 }
 0x83b   : > { %v1501_v12 = vmul.f32 %v2365_v10, %v1496_v0  ;;  %v1519_v52 = vadd.f32 %v2361_v3, %v1518_v9  ;;  %vm1506_vm5 = vweird.f32 %v2365_v10  ;;  %v1467_v0 = vpop.f32.mrf.mxu1 }
 0x83c   : > { %2368 = vrcp.f32 %v1498_v11  ;;  %v2367_v14 = vpop.eup %2366  ;;  %vm2867_vm9 = vmor %vm1505_vm8, %vm1506_vm5  ;;  %v1541_v46 = vand.u32 2147483648, %v1498_v11  ;;  %v1539_v50 = vand.u32 2147483647, %v1498_v11  ;;  %vm1535_vm15 = vweird.f32 %v1498_v11 }
 0x83d   : > { %v1502_v15 = vsub.f32 1.0, %v1501_v12  ;;  %v1546_v17 = vmul.f32 %v2367_v14, %v1499_v6  ;;  %v1523_v23 = vsel %vm2861_vm4, %v2361_v3, %v1519_v52  ;;  %vm1551_vm7 = vweird.f32 %v2367_v14 }
 0x83e   : > { %v1528_v36 = vsel %vm1525_vm6, %v1527_v24, %v1523_v23  ;;  %vm1552_vm12 = vmor %vm1550_vm11, %vm1551_vm7  ;;  %v1542_v26 = vor.u32 1.1754944e-38, %v1541_v46  ;;  %vm1540_vm1 = vcmp.eq.f32.partialorder %v1539_v50, 8.507059e+37 }
 0x83f   : > { %v1503_v19 = vmul.f32 %v2365_v10, %v1502_v15  ;;  %v1547_v27 = vsub.f32 1.0, %v1546_v17  ;;  %v1561_v45 = vmul.f32 %v1528_v36, %v2842_v47 }
 0x841   : > { %v1504_v28 = vadd.f32 %v2365_v10, %v1503_v19  ;;  %v1548_v33 = vmul.f32 %v2367_v14, %v1547_v27  ;;  %v1565_v22 = vmul.f32 %v1561_v45, %v1479_v20 }
 0x842   : > { %v2369_v31 = vpop.eup %2368 }
 0x843   : > { %v1531_v37 = vmul.f32 %v2369_v31, %v1498_v11  ;;  %v1549_v41 = vadd.f32 %v2367_v14, %v1548_v33  ;;  %v1508_v42 = vsel %vm2867_vm9, %v2365_v10, %v1504_v28  ;;  %vm1536_vm14 = vweird.f32 %v2369_v31 }
 0x844   : > { %v1513_v51 = vsel %vm2871_vm10, %v1512_v43, %v1508_v42  ;;  %vm1537_vm0 = vmor %vm1535_vm15, %vm1536_vm14 }
 0x845   : > { %v1532_v44 = vsub.f32 1.0, %v1531_v37  ;;  %v1553_v38 = vsel %vm1552_vm12, %v2367_v14, %v1549_v41  ;;  %v1560_v47 = vmul.f32 %v1513_v51, %v2848_v21 }
 0x846   : > { %v1558_v48 = vsel %vm1555_vm13, %v1557_v4, %v1553_v38 }
 0x847   : > { %v1533_v49 = vmul.f32 %v2369_v31, %v1532_v44  ;;  %v1563_v53 = vmul.f32 %v1558_v48, %v2852_v55  ;;  %v1564_v1 = vmul.f32 %v1560_v47, %v1465_v39 }
 0x849   : > { %v1534_v54 = vadd.f32 %v2369_v31, %v1533_v49  ;;  %v1567_v57 = vmul.f32 %v1563_v53, %v1481_v56 }
 0x84b   : > { %v1538_v59 = vsel %vm1537_vm0, %v2369_v31, %v1534_v54  ;;  %v1569_v62 = vpack.c.bf16 %v1567_v57, %v1565_v22 }
 0x84c   : > { %v1543_v61 = vsel %vm1540_vm1, %v1542_v26, %v1538_v59 }
 0x84d   : > { %v1562_v63 = vmul.f32 %v1543_v61, %v2857_v60  ;;  %1720 = vmatmul.bf16.vlgmr.msra.gmra.mxu0 %v1569_v62 }
 0x84f   : > { %v1566_v3 = vmul.f32 %v1562_v63, %v1467_v0 }
 0x851   : > { %v1568_v55 = vpack.c.bf16 %v1566_v3, %v1564_v1 }
 0x853   : > { %1706 = vmatmul.bf16.vlgmr.msrb.gmra.mxu3 %v1568_v55 }
 0x8ca   : > { %v1721_v5 = vpop.f32.mrf.mxu0 }
 0x8d2   : > { %v1723_v10 = vpop.f32.mrf.mxu0 }
 0x8d6   : > { %v1707_v6 = vpop.f32.mrf.mxu3 }
 0x8d7   : > { %v1708_v7 = vadd.f32 %v1707_v6, %v2751_v34 }
 0x8d9   : > { %v1722_v8 = vadd.f32 %v1721_v5, %v1708_v7 }
 0x8db   : > { %1726 = vst [vmem:[#allocation2] sm:$0xff] %v1722_v8 }
 0x8de   : > { %v1709_v9 = vpop.f32.mrf.mxu3 }
 0x8df   : > { %v1710_v21 = vadd.f32 %v1709_v9, %v2756_v2  ;;  %1731 = sbr.rel (%p2208_p5) target bundleno = 2429 (0x97d), region = 76 }
 0x8e1   : > { %v1724_v11 = vadd.f32 %v1723_v10, %v1710_v21 }
 0x8e3   : > { %1727 = vst [vmem:[#allocation2 + $0x8] sm:$0xff] %v1724_v11 }
 0x8e4   : > { %v1733_v60 = vmul.f32 %v1722_v8, %v1722_v8  ;;  %v1734_v12 = vmul.f32 %v1724_v11, %v1724_v11  ;;  %v2370_v27 = vld [vmem:[%s2909_s11] ss:$0 sm:$0xff] }
 0x8e6   : > { %1735 = vadd.xlane.f32.xlu0 %v1733_v60 }
 0x8ee   : > { %1737 = vadd.xlane.f32.xlu0 %v1734_v12 }
 0x959   : > { %v1736_v52 = vpop.xlane.xlu0 %1735 }
 0x95a   : > { %v1739_v13 = vmul.f32 %v1736_v52, %v2585_v58 }
 0x95c   : > { %v1741_v14 = vadd.f32 1e-06, %v1739_v13 }
 0x95e   : > { %2371 = vrsqrt.f32 %v1741_v14  ;;  %vm1749_vm3 = vweird.f32 %v1741_v14 }
 0x961   : > { %v1738_v34 = vpop.xlane.xlu0 %1737 }
 0x962   : > { %v1740_v15 = vmul.f32 %v1738_v34, %v2585_v58 }
 0x964   : > { %v2372_v16 = vpop.eup %2371  ;;  %v1742_v2 = vadd.f32 1e-06, %v1740_v15 }
 0x965   : > { %v1744_v17 = vmul.f32 %v2372_v16, %v1741_v14  ;;  %vm1750_vm2 = vweird.f32 %v2372_v16 }
 0x966   : > { %2373 = vrsqrt.f32 %v1742_v2  ;;  %vm1751_vm4 = vmor %vm1749_vm3, %vm1750_vm2  ;;  %vm1759_vm6 = vweird.f32 %v1742_v2 }
 0x967   : > { %v1745_v18 = vmul.f32 %v2372_v16, %v1744_v17 }
 0x969   : > { %v1746_v19 = vmul.f32 0.5, %v1745_v18 }
 0x96b   : > { %v1747_v20 = vsub.f32 1.5, %v1746_v19 }
 0x96c   : > { %v2374_v23 = vpop.eup %2373 }
 0x96d   : > { %v1748_v24 = vmul.f32 %v2372_v16, %v1747_v20  ;;  %v1754_v25 = vmul.f32 %v2374_v23, %v1742_v2  ;;  %vm1760_vm5 = vweird.f32 %v2374_v23 }
 0x96e   : > { %vm1761_vm7 = vmor %vm1759_vm6, %vm1760_vm5 }
 0x96f   : > { %v1752_v28 = vsel %vm1751_vm4, %v2372_v16, %v1748_v24  ;;  %v1755_v29 = vmul.f32 %v2374_v23, %v1754_v25 }
 0x970   : > { %v1763_v58 = vmul.f32 %v1752_v28, %v1722_v8 }
 0x971   : > { %v1756_v30 = vmul.f32 0.5, %v1755_v29 }
 0x972   : > { %v1768_v31 = vmul.f32 %v2370_v27, %v1763_v58 }
 0x973   : > { %v1757_v33 = vsub.f32 1.5, %v1756_v30 }
 0x974   : > { %1770 = vst [vmem:[#allocation3] sm:$0xff] %v1768_v31 }
 0x975   : > { %v1758_v35 = vmul.f32 %v2374_v23, %v1757_v33 }
 0x977   : > { %v1762_v36 = vsel %vm1761_vm7, %v2374_v23, %v1758_v35 }
 0x978   : > { %v1764_v37 = vmul.f32 %v1762_v36, %v1724_v11 }
 0x97a   : > { %v1769_v39 = vmul.f32 %v2370_v27, %v1764_v37 }
 0x97c   : > { %1771 = vst [vmem:[#allocation3 + $0x8] sm:$0xff] %v1769_v39 }
 0x97d PF: > { %p2293_p6 = scmp.eq.s32.totalorder %s2493_s22, 1  ;;  %s2419_s26 = smov [#allocation3]  }
 0x97e   : > { %s1777_s28 = sshll.u32 %s2419_s26, 4  ;;  %s2923_s15 = sld [smem:[#allocation8_spill]]  ;;  %s1778_s28 = int_to_ptr.vmem [resolvable:$true] %s1777_s28 }
 0x97f   : > { %s2420_s16 = smov 128   ;;  %s2421_s18 = smov 8  }
 0x984   : > { %s1779_s17 = sshll.u32 %s2923_s15, 4  ;;  %s1780_s17 = int_to_ptr.hbm [resolvable:$true] %s1779_s17 }
 0x985   : > { %2290 = dma.vmem_to_hbm [thread:$0]  (%p2293_p6), %s1778_s28, 256, %s1780_s17, [#allocation4], %s2420_s16, %s2420_s16, %s2421_s18  }
 0x986   : > { %2408 = dma.done.wait (%p2293_p6), [#allocation4], 256  }
 0x987   : > { %2410 = vsyncadd (%p2293_p6), [#allocation4], 4294967040 }
 0x988 PF: > { %s2924_s19 = sld [smem:[#allocation6_spill]] }
 0x98e   : > { %s23_s21 = sadd.s32 1, %s2924_s19  }
 0x98f   : > { %p20_p7 = scmp.ge.s32.totalorder %s23_s21, 4  }
 0x991   :  { %22 = sbr.rel (!%p20_p7) target bundleno = 4 (0x4), region = 121 }
 0x996   :  { %1796 = vsyncpa [#allocation4], 1 }
 0x997   :  { %1798 = vsyncpa [#allocation4 + $0x1], 1 }

</bundles_post_ra>
